<compile_context>
chip_gen: v7x
topology: tpu7x:2x2x1
jax: 0.10.0
libtpu: 0.0.40
codegen_flags: <defaults>
</compile_context>

<pallas_src>
import functools

import jax
import jax.numpy as jnp
from jax.experimental import pallas as pl
from jax.experimental.pallas import tpu as pltpu


def _round_up(x, m):
    return (x + m - 1) // m * m


# ----------------------------- Pallas kernels ------------------------------

def _conv_mm_kernel(p_ref, w_ref, b_ref, o_ref):
    """Fused im2col matmul (bf16 MXU) + f32 bias + ReLU for one M-tile."""
    acc = jnp.dot(p_ref[...], w_ref[...], preferred_element_type=jnp.float32)
    acc = acc + b_ref[...]                       # (1, Np) broadcast over rows
    o_ref[...] = jnp.maximum(acc, 0.0)


def _maxpool3x3s2_kernel(ee_ref, eo_ref, oe_ref, oo_ref, o_ref, *, oh, ow):
    """3x3 stride-2 max pool for one batch element.

    Inputs are the even/odd row/col phase de-interleaves of the NHWC input
    (all padded to a common (1, He, We, C) shape; padded cells are never read),
    so every window tap is a contiguous slice — no strided VMEM access.
    """
    m = jnp.maximum(ee_ref[:, 0:oh, 0:ow, :], ee_ref[:, 0:oh, 1:ow + 1, :])
    m = jnp.maximum(m, ee_ref[:, 1:oh + 1, 0:ow, :])
    m = jnp.maximum(m, ee_ref[:, 1:oh + 1, 1:ow + 1, :])
    m = jnp.maximum(m, eo_ref[:, 0:oh, 0:ow, :])
    m = jnp.maximum(m, eo_ref[:, 1:oh + 1, 0:ow, :])
    m = jnp.maximum(m, oe_ref[:, 0:oh, 0:ow, :])
    m = jnp.maximum(m, oe_ref[:, 0:oh, 1:ow + 1, :])
    m = jnp.maximum(m, oo_ref[:, 0:oh, 0:ow, :])
    o_ref[...] = m


# ------------------------------ layer wrappers ------------------------------

def _im2col(x, kh, kw, stride, pad):
    # x: (B, H, W, C) NHWC. Patch feature order = (kh, kw, cin), matching the
    # weight reshape transpose(2, 3, 1, 0) done in pack_params().
    if pad:
        x = jnp.pad(x, ((0, 0), (pad, pad), (pad, pad), (0, 0)))
    B, H, W, C = x.shape
    oh = (H - kh) // stride + 1
    ow = (W - kw) // stride + 1
    cols = []
    for i in range(kh):
        for j in range(kw):
            cols.append(x[:, i:i + stride * oh:stride, j:j + stride * ow:stride, :])
    patches = jnp.concatenate(cols, axis=-1)     # (B, oh, ow, kh*kw*C)
    return patches, oh, ow


def _pick_tile_m(M, Kp, Np, budget_bytes=20 * 1024 * 1024):
    """Largest M-tile (<=256) whose double-buffered working set fits the budget."""
    tile = 256
    while tile > 8:
        need = (2 * tile * Kp * 2          # patches, bf16, double-buffered
                + 2 * tile * Np * 4        # output, f32, double-buffered
                + Kp * Np * 2 + Np * 4)    # resident weight + bias
        if need <= budget_bytes:
            break
        tile //= 2
    return min(tile, _round_up(M, 8))


def conv2d_relu(x_nhwc, w_pad, b_pad, cfg):
    """x_nhwc: (B,H,W,cin) f32.  w_pad: (Kp,Np) bf16.  b_pad: (1,Np) f32."""
    kh = kw = cfg["k"]
    stride, pad = cfg["stride"], cfg["pad"]
    cin, cout = cfg["cin"], cfg["cout"]
    B = x_nhwc.shape[0]

    patches, oh, ow = _im2col(x_nhwc.astype(jnp.bfloat16), kh, kw, stride, pad)
    M, K = B * oh * ow, kh * kw * cin
    Kp, Np = w_pad.shape
    p2d = patches.reshape(M, K)

    tile_m = _pick_tile_m(M, Kp, Np)
    Mp = _round_up(M, tile_m)
    p_pad = jnp.pad(p2d, ((0, Mp - M), (0, Kp - K)))     # bf16, lane-aligned K

    out = pl.pallas_call(
        _conv_mm_kernel,
        grid=(Mp // tile_m,),
        out_shape=jax.ShapeDtypeStruct((Mp, Np), jnp.float32),
        in_specs=[
            pl.BlockSpec((tile_m, Kp), lambda i: (i, 0)),   # patch tile follows grid
            pl.BlockSpec((Kp, Np), lambda i: (0, 0)),       # weight resident
            pl.BlockSpec((1, Np), lambda i: (0, 0)),        # bias resident
        ],
        out_specs=pl.BlockSpec((tile_m, Np), lambda i: (i, 0)),
        compiler_params=pltpu.CompilerParams(
            dimension_semantics=("parallel",),              # megacore on v7x
            vmem_limit_bytes=32 * 1024 * 1024,
        ),
    )(p_pad, w_pad, b_pad)

    return out[:M, :cout].reshape(B, oh, ow, cout)


def maxpool2d_3x3s2(x_nhwc):
    """MaxPool2d(kernel_size=3, stride=2) — the only pooling config in AlexNet.features."""
    B, H, W, C = x_nhwc.shape
    assert H >= 3 and W >= 3
    oh = (H - 3) // 2 + 1
    ow = (W - 3) // 2 + 1
    He, We = (H + 1) // 2, (W + 1) // 2

    # Even/odd phase de-interleave (total bytes ≈ input bytes; no 9x staging).
    ee = x_nhwc[:, 0::2, 0::2, :]
    eo = x_nhwc[:, 0::2, 1::2, :]
    oe = x_nhwc[:, 1::2, 0::2, :]
    oo = x_nhwc[:, 1::2, 1::2, :]

    def _pad_phase(a):
        return jnp.pad(a, ((0, 0), (0, He - a.shape[1]), (0, We - a.shape[2]), (0, 0)))

    ee, eo, oe, oo = _pad_phase(ee), _pad_phase(eo), _pad_phase(oe), _pad_phase(oo)

    kern = functools.partial(_maxpool3x3s2_kernel, oh=oh, ow=ow)
    out = pl.pallas_call(
        kern,
        grid=(B,),
        out_shape=jax.ShapeDtypeStruct((B, oh, ow, C), x_nhwc.dtype),
        in_specs=[pl.BlockSpec((1, He, We, C), lambda b: (b, 0, 0, 0))] * 4,
        out_specs=pl.BlockSpec((1, oh, ow, C), lambda b: (b, 0, 0, 0)),
        compiler_params=pltpu.CompilerParams(dimension_semantics=("parallel",)),
    )(ee, eo, oe, oo)
    return out


# ------------------------- AlexBottom (features stack) ----------------------

# Scaled-down AlexNet `features` (layer order / kernel sizes / strides / pads
# match torchvision AlexNet; channel counts reduced for the small demo).
CFG = [
    ("conv", dict(cin=3,  cout=16, k=11, stride=4, pad=2)),   # Conv2d + ReLU
    ("pool", dict(k=3, stride=2)),                            # MaxPool2d
    ("conv", dict(cin=16, cout=32, k=5, stride=1, pad=2)),
    ("pool", dict(k=3, stride=2)),
    ("conv", dict(cin=32, cout=48, k=3, stride=1, pad=1)),
    ("conv", dict(cin=48, cout=32, k=3, stride=1, pad=1)),
    ("conv", dict(cin=32, cout=32, k=3, stride=1, pad=1)),
    ("pool", dict(k=3, stride=2)),
]


def init_params(key):
    """Raw PyTorch-layout (OIHW) f32 weights + biases."""
    params = []
    for kind, cfg in CFG:
        if kind != "conv":
            continue
        key, kw_, kb_ = jax.random.split(key, 3)
        fan_in = cfg["cin"] * cfg["k"] * cfg["k"]
        w = jax.random.normal(kw_, (cfg["cout"], cfg["cin"], cfg["k"], cfg["k"]),
                              jnp.float32) * (2.0 / fan_in) ** 0.5
        b = jax.random.normal(kb_, (cfg["cout"],), jnp.float32) * 0.01
        params.append((w, b))
    return params


def pack_params(params):
    """One-time layout work: OIHW -> (Kp, Np) bf16 matmul weights, (1, Np) f32 bias."""
    conv_cfgs = [cfg for kind, cfg in CFG if kind == "conv"]
    packed = []
    for (w, b), cfg in zip(params, conv_cfgs):
        cout, cin, kh, kw = w.shape
        K = kh * kw * cin
        Kp = _round_up(K, 128)
        Np = _round_up(cout, 128)
        w2d = jnp.transpose(w, (2, 3, 1, 0)).reshape(K, cout)
        w_pad = jnp.pad(w2d, ((0, Kp - K), (0, Np - cout))).astype(jnp.bfloat16)
        b_pad = jnp.pad(b, (0, Np - cout)).reshape(1, Np).astype(jnp.float32)
        packed.append((w_pad, b_pad))
    return packed


def alex_bottom_forward(x_nchw, packed_params):
    # layout: NCHW in (PyTorch), NHWC inside the kernels, NCHW out.
    x = jnp.transpose(x_nchw, (0, 2, 3, 1)).astype(jnp.float32)
    pi = 0
    for kind, cfg in CFG:
        if kind == "conv":
            w_pad, b_pad = packed_params[pi]
            pi += 1
            x = conv2d_relu(x, w_pad, b_pad, cfg)
        else:
            x = maxpool2d_3x3s2(x)
    return jnp.transpose(x, (0, 3, 1, 2))


def reference_forward(x_nchw, params):
    """Pure-JAX reference for validation (no Pallas)."""
    x = x_nchw
    pi = 0
    for kind, cfg in CFG:
        if kind == "conv":
            w, b = params[pi]
            pi += 1
            x = jax.lax.conv_general_dilated(
                x, w, (cfg["stride"],) * 2, [(cfg["pad"], cfg["pad"])] * 2,
                dimension_numbers=("NCHW", "OIHW", "NCHW"),
                precision=jax.lax.Precision.HIGHEST)
            x = jnp.maximum(x + b[None, :, None, None], 0.0)
        else:
            x = jax.lax.reduce_window(
                x, -jnp.inf, jax.lax.max,
                (1, 1, cfg["k"], cfg["k"]), (1, 1, cfg["stride"], cfg["stride"]),
                "VALID")
    return x


if __name__ == "__main__":
    key = jax.random.PRNGKey(0)
    x = jax.random.normal(key, (2, 3, 64, 64), jnp.float32)   # small NCHW input
    params = init_params(jax.random.PRNGKey(1))
    packed = pack_params(params)                              # one-time layout work

    fwd = jax.jit(alex_bottom_forward)
    out = fwd(x, packed)
    jax.block_until_ready(out)

    ref = reference_forward(x, params)
    assert out.shape == ref.shape == (2, 32, 1, 1), (out.shape, ref.shape)
    err = float(jnp.max(jnp.abs(out - ref)))
    assert jnp.allclose(out, ref, atol=5e-2, rtol=1e-1), f"mismatch vs reference: {err}"

    print("KERNEL_OK")
</pallas_src>

<mosaic_0001>
module attributes {stable_mosaic.version = 11 : i64} {
  func.func @_conv_mm_kernel(%arg0: i32, %arg1: memref<256x384xbf16, #tpu.memory_space<vmem>>, %arg2: memref<384x128xbf16, #tpu.memory_space<vmem>>, %arg3: memref<1x128xf32, #tpu.memory_space<vmem>>, %arg4: memref<256x128xf32, #tpu.memory_space<vmem>>) attributes {dimension_semantics = [#tpu.dimension_semantics<parallel>], iteration_bounds = array<i64: 2>, scalar_prefetch = 0 : i64, scratch_operands = 0 : i64, tpu.core_type = #tpu.core_type<tc>, window_params = [{transform_indices = @transform_0, window_bounds = array<i64: 256, 384>}, {pipeline_mode = #tpu.pipeline_mode<synchronous>, transform_indices = @transform_1, window_bounds = array<i64: 384, 128>}, {pipeline_mode = #tpu.pipeline_mode<synchronous>, transform_indices = @transform_2, window_bounds = array<i64: 1, 128>}, {transform_indices = @transform_3, window_bounds = array<i64: 256, 128>}]} {
    %c0 = arith.constant 0 : index
    %c0_0 = arith.constant 0 : index
    %0 = vector.load %arg1[%c0, %c0_0] : memref<256x384xbf16, #tpu.memory_space<vmem>>, vector<256x384xbf16>
    %c0_1 = arith.constant 0 : index
    %c0_2 = arith.constant 0 : index
    %1 = vector.load %arg2[%c0_1, %c0_2] : memref<384x128xbf16, #tpu.memory_space<vmem>>, vector<384x128xbf16>
    %cst = arith.constant dense<0.000000e+00> : vector<256x128xf32>
    %2 = tpu.matmul %0, %1, %cst {dimension_numbers = #tpu.dot_dimension_numbers<[1], [0], [0], [1], [0, 0, 1, 1], [], []>} : vector<256x384xbf16>, vector<384x128xbf16>, vector<256x128xf32> -> vector<256x128xf32>
    %c0_3 = arith.constant 0 : index
    %c0_4 = arith.constant 0 : index
    %3 = vector.load %arg3[%c0_3, %c0_4] : memref<1x128xf32, #tpu.memory_space<vmem>>, vector<1x128xf32>
    %4 = vector.broadcast %3 : vector<1x128xf32> to vector<256x128xf32>
    %5 = arith.addf %2, %4 : vector<256x128xf32>
    %cst_5 = arith.constant 0.000000e+00 : f32
    %6 = vector.broadcast %cst_5 : f32 to vector<256x128xf32>
    %7 = arith.maximumf %5, %6 : vector<256x128xf32>
    %c0_6 = arith.constant 0 : index
    %c0_7 = arith.constant 0 : index
    %8 = vector.load %arg4[%c0_6, %c0_7] : memref<256x128xf32, #tpu.memory_space<vmem>>, vector<256x128xf32>
    tpu.vector_store %arg4[%c0_6, %c0_7], %7 {strides = array<i32>} : memref<256x128xf32, #tpu.memory_space<vmem>>, vector<256x128xf32>,
    return
  }
  func.func @transform_0(%arg0: i32) -> (i32, i32) {
    %c0_i32 = arith.constant 0 : i32
    %c0_i32_0 = arith.constant 0 : i32
    return %arg0, %c0_i32 : i32, i32
  }
  func.func @transform_1(%arg0: i32) -> (i32, i32) {
    %c0_i32 = arith.constant 0 : i32
    %c0_i32_0 = arith.constant 0 : i32
    %c0_i32_1 = arith.constant 0 : i32
    return %c0_i32, %c0_i32_0 : i32, i32
  }
  func.func @transform_2(%arg0: i32) -> (i32, i32) {
    %c0_i32 = arith.constant 0 : i32
    %c0_i32_0 = arith.constant 0 : i32
    %c0_i32_1 = arith.constant 0 : i32
    return %c0_i32, %c0_i32_0 : i32, i32
  }
  func.func @transform_3(%arg0: i32) -> (i32, i32) {
    %c0_i32 = arith.constant 0 : i32
    %c0_i32_0 = arith.constant 0 : i32
    return %arg0, %c0_i32 : i32, i32
  }
}

module attributes {stable_mosaic.version = 11 : i64} {
  func.func @_maxpool3x3s2_kernel(%arg0: i32, %arg1: memref<1x8x8x16xf32, #tpu.memory_space<vmem>>, %arg2: memref<1x8x8x16xf32, #tpu.memory_space<vmem>>, %arg3: memref<1x8x8x16xf32, #tpu.memory_space<vmem>>, %arg4: memref<1x8x8x16xf32, #tpu.memory_space<vmem>>, %arg5: memref<1x7x7x16xf32, #tpu.memory_space<vmem>>) attributes {dimension_semantics = [#tpu.dimension_semantics<parallel>], iteration_bounds = array<i64: 2>, scalar_prefetch = 0 : i64, scratch_operands = 0 : i64, tpu.core_type = #tpu.core_type<tc>, window_params = [{transform_indices = @transform_0, window_bounds = array<i64: 1, 8, 8, 16>}, {transform_indices = @transform_1, window_bounds = array<i64: 1, 8, 8, 16>}, {transform_indices = @transform_2, window_bounds = array<i64: 1, 8, 8, 16>}, {transform_indices = @transform_3, window_bounds = array<i64: 1, 8, 8, 16>}, {transform_indices = @transform_4, window_bounds = array<i64: 1, 7, 7, 16>}]} {
    %c0 = arith.constant 0 : index
    %c0_0 = arith.constant 0 : index
    %c0_1 = arith.constant 0 : index
    %c0_2 = arith.constant 0 : index
    %0 = vector.load %arg1[%c0, %c0_0, %c0_1, %c0_2] : memref<1x8x8x16xf32, #tpu.memory_space<vmem>>, vector<1x7x7x16xf32>
    %c0_3 = arith.constant 0 : index
    %c0_4 = arith.constant 0 : index
    %c1 = arith.constant 1 : index
    %c0_5 = arith.constant 0 : index
    %1 = vector.load %arg1[%c0_3, %c0_4, %c1, %c0_5] : memref<1x8x8x16xf32, #tpu.memory_space<vmem>>, vector<1x7x7x16xf32>
    %2 = arith.maximumf %0, %1 : vector<1x7x7x16xf32>
    %c0_6 = arith.constant 0 : index
    %c1_7 = arith.constant 1 : index
    %c0_8 = arith.constant 0 : index
    %c0_9 = arith.constant 0 : index
    %3 = vector.load %arg1[%c0_6, %c1_7, %c0_8, %c0_9] : memref<1x8x8x16xf32, #tpu.memory_space<vmem>>, vector<1x7x7x16xf32>
    %4 = arith.maximumf %2, %3 : vector<1x7x7x16xf32>
    %c0_10 = arith.constant 0 : index
    %c1_11 = arith.constant 1 : index
    %c1_12 = arith.constant 1 : index
    %c0_13 = arith.constant 0 : index
    %5 = vector.load %arg1[%c0_10, %c1_11, %c1_12, %c0_13] : memref<1x8x8x16xf32, #tpu.memory_space<vmem>>, vector<1x7x7x16xf32>
    %6 = arith.maximumf %4, %5 : vector<1x7x7x16xf32>
    %c0_14 = arith.constant 0 : index
    %c0_15 = arith.constant 0 : index
    %c0_16 = arith.constant 0 : index
    %c0_17 = arith.constant 0 : index
    %7 = vector.load %arg2[%c0_14, %c0_15, %c0_16, %c0_17] : memref<1x8x8x16xf32, #tpu.memory_space<vmem>>, vector<1x7x7x16xf32>
    %8 = arith.maximumf %6, %7 : vector<1x7x7x16xf32>
    %c0_18 = arith.constant 0 : index
    %c1_19 = arith.constant 1 : index
    %c0_20 = arith.constant 0 : index
    %c0_21 = arith.constant 0 : index
    %9 = vector.load %arg2[%c0_18, %c1_19, %c0_20, %c0_21] : memref<1x8x8x16xf32, #tpu.memory_space<vmem>>, vector<1x7x7x16xf32>
    %10 = arith.maximumf %8, %9 : vector<1x7x7x16xf32>
    %c0_22 = arith.constant 0 : index
    %c0_23 = arith.constant 0 : index
    %c0_24 = arith.constant 0 : index
    %c0_25 = arith.constant 0 : index
    %11 = vector.load %arg3[%c0_22, %c0_23, %c0_24, %c0_25] : memref<1x8x8x16xf32, #tpu.memory_space<vmem>>, vector<1x7x7x16xf32>
    %12 = arith.maximumf %10, %11 : vector<1x7x7x16xf32>
    %c0_26 = arith.constant 0 : index
    %c0_27 = arith.constant 0 : index
    %c1_28 = arith.constant 1 : index
    %c0_29 = arith.constant 0 : index
    %13 = vector.load %arg3[%c0_26, %c0_27, %c1_28, %c0_29] : memref<1x8x8x16xf32, #tpu.memory_space<vmem>>, vector<1x7x7x16xf32>
    %14 = arith.maximumf %12, %13 : vector<1x7x7x16xf32>
    %c0_30 = arith.constant 0 : index
    %c0_31 = arith.constant 0 : index
    %c0_32 = arith.constant 0 : index
    %c0_33 = arith.constant 0 : index
    %15 = vector.load %arg4[%c0_30, %c0_31, %c0_32, %c0_33] : memref<1x8x8x16xf32, #tpu.memory_space<vmem>>, vector<1x7x7x16xf32>
    %16 = arith.maximumf %14, %15 : vector<1x7x7x16xf32>
    %c0_34 = arith.constant 0 : index
    %c0_35 = arith.constant 0 : index
    %c0_36 = arith.constant 0 : index
    %c0_37 = arith.constant 0 : index
    %17 = vector.load %arg5[%c0_34, %c0_35, %c0_36, %c0_37] : memref<1x7x7x16xf32, #tpu.memory_space<vmem>>, vector<1x7x7x16xf32>
    tpu.vector_store %arg5[%c0_34, %c0_35, %c0_36, %c0_37], %16 {strides = array<i32>} : memref<1x7x7x16xf32, #tpu.memory_space<vmem>>, vector<1x7x7x16xf32>,
    return
  }
  func.func @transform_0(%arg0: i32) -> (i32, i32, i32, i32) {
    %c0_i32 = arith.constant 0 : i32
    %c0_i32_0 = arith.constant 0 : i32
    %c0_i32_1 = arith.constant 0 : i32
    %c0_i32_2 = arith.constant 0 : i32
    return %arg0, %c0_i32, %c0_i32_0, %c0_i32_1 : i32, i32, i32, i32
  }
  func.func @transform_1(%arg0: i32) -> (i32, i32, i32, i32) {
    %c0_i32 = arith.constant 0 : i32
    %c0_i32_0 = arith.constant 0 : i32
    %c0_i32_1 = arith.constant 0 : i32
    %c0_i32_2 = arith.constant 0 : i32
    return %arg0, %c0_i32, %c0_i32_0, %c0_i32_1 : i32, i32, i32, i32
  }
  func.func @transform_2(%arg0: i32) -> (i32, i32, i32, i32) {
    %c0_i32 = arith.constant 0 : i32
    %c0_i32_0 = arith.constant 0 : i32
    %c0_i32_1 = arith.constant 0 : i32
    %c0_i32_2 = arith.constant 0 : i32
    return %arg0, %c0_i32, %c0_i32_0, %c0_i32_1 : i32, i32, i32, i32
  }
  func.func @transform_3(%arg0: i32) -> (i32, i32, i32, i32) {
    %c0_i32 = arith.constant 0 : i32
    %c0_i32_0 = arith.constant 0 : i32
    %c0_i32_1 = arith.constant 0 : i32
    %c0_i32_2 = arith.constant 0 : i32
    return %arg0, %c0_i32, %c0_i32_0, %c0_i32_1 : i32, i32, i32, i32
  }
  func.func @transform_4(%arg0: i32) -> (i32, i32, i32, i32) {
    %c0_i32 = arith.constant 0 : i32
    %c0_i32_0 = arith.constant 0 : i32
    %c0_i32_1 = arith.constant 0 : i32
    %c0_i32_2 = arith.constant 0 : i32
    return %arg0, %c0_i32, %c0_i32_0, %c0_i32_1 : i32, i32, i32, i32
  }
}

module attributes {stable_mosaic.version = 11 : i64} {
  func.func @_conv_mm_kernel(%arg0: i32, %arg1: memref<104x512xbf16, #tpu.memory_space<vmem>>, %arg2: memref<512x128xbf16, #tpu.memory_space<vmem>>, %arg3: memref<1x128xf32, #tpu.memory_space<vmem>>, %arg4: memref<104x128xf32, #tpu.memory_space<vmem>>) attributes {dimension_semantics = [#tpu.dimension_semantics<parallel>], iteration_bounds = array<i64: 1>, scalar_prefetch = 0 : i64, scratch_operands = 0 : i64, tpu.core_type = #tpu.core_type<tc>, window_params = [{transform_indices = @transform_0, window_bounds = array<i64: 104, 512>}, {pipeline_mode = #tpu.pipeline_mode<synchronous>, transform_indices = @transform_1, window_bounds = array<i64: 512, 128>}, {pipeline_mode = #tpu.pipeline_mode<synchronous>, transform_indices = @transform_2, window_bounds = array<i64: 1, 128>}, {transform_indices = @transform_3, window_bounds = array<i64: 104, 128>}]} {
    %c0 = arith.constant 0 : index
    %c0_0 = arith.constant 0 : index
    %0 = vector.load %arg1[%c0, %c0_0] : memref<104x512xbf16, #tpu.memory_space<vmem>>, vector<104x512xbf16>
    %c0_1 = arith.constant 0 : index
    %c0_2 = arith.constant 0 : index
    %1 = vector.load %arg2[%c0_1, %c0_2] : memref<512x128xbf16, #tpu.memory_space<vmem>>, vector<512x128xbf16>
    %cst = arith.constant dense<0.000000e+00> : vector<104x128xf32>
    %2 = tpu.matmul %0, %1, %cst {dimension_numbers = #tpu.dot_dimension_numbers<[1], [0], [0], [1], [0, 0, 1, 1], [], []>} : vector<104x512xbf16>, vector<512x128xbf16>, vector<104x128xf32> -> vector<104x128xf32>
    %c0_3 = arith.constant 0 : index
    %c0_4 = arith.constant 0 : index
    %3 = vector.load %arg3[%c0_3, %c0_4] : memref<1x128xf32, #tpu.memory_space<vmem>>, vector<1x128xf32>
    %4 = vector.broadcast %3 : vector<1x128xf32> to vector<104x128xf32>
    %5 = arith.addf %2, %4 : vector<104x128xf32>
    %cst_5 = arith.constant 0.000000e+00 : f32
    %6 = vector.broadcast %cst_5 : f32 to vector<104x128xf32>
    %7 = arith.maximumf %5, %6 : vector<104x128xf32>
    %c0_6 = arith.constant 0 : index
    %c0_7 = arith.constant 0 : index
    %8 = vector.load %arg4[%c0_6, %c0_7] : memref<104x128xf32, #tpu.memory_space<vmem>>, vector<104x128xf32>
    tpu.vector_store %arg4[%c0_6, %c0_7], %7 {strides = array<i32>} : memref<104x128xf32, #tpu.memory_space<vmem>>, vector<104x128xf32>,
    return
  }
  func.func @transform_0(%arg0: i32) -> (i32, i32) {
    %c0_i32 = arith.constant 0 : i32
    %c0_i32_0 = arith.constant 0 : i32
    return %arg0, %c0_i32 : i32, i32
  }
  func.func @transform_1(%arg0: i32) -> (i32, i32) {
    %c0_i32 = arith.constant 0 : i32
    %c0_i32_0 = arith.constant 0 : i32
    %c0_i32_1 = arith.constant 0 : i32
    return %c0_i32, %c0_i32_0 : i32, i32
  }
  func.func @transform_2(%arg0: i32) -> (i32, i32) {
    %c0_i32 = arith.constant 0 : i32
    %c0_i32_0 = arith.constant 0 : i32
    %c0_i32_1 = arith.constant 0 : i32
    return %c0_i32, %c0_i32_0 : i32, i32
  }
  func.func @transform_3(%arg0: i32) -> (i32, i32) {
    %c0_i32 = arith.constant 0 : i32
    %c0_i32_0 = arith.constant 0 : i32
    return %arg0, %c0_i32 : i32, i32
  }
}

module attributes {stable_mosaic.version = 11 : i64} {
  func.func @_maxpool3x3s2_kernel(%arg0: i32, %arg1: memref<1x4x4x32xf32, #tpu.memory_space<vmem>>, %arg2: memref<1x4x4x32xf32, #tpu.memory_space<vmem>>, %arg3: memref<1x4x4x32xf32, #tpu.memory_space<vmem>>, %arg4: memref<1x4x4x32xf32, #tpu.memory_space<vmem>>, %arg5: memref<1x3x3x32xf32, #tpu.memory_space<vmem>>) attributes {dimension_semantics = [#tpu.dimension_semantics<parallel>], iteration_bounds = array<i64: 2>, scalar_prefetch = 0 : i64, scratch_operands = 0 : i64, tpu.core_type = #tpu.core_type<tc>, window_params = [{transform_indices = @transform_0, window_bounds = array<i64: 1, 4, 4, 32>}, {transform_indices = @transform_1, window_bounds = array<i64: 1, 4, 4, 32>}, {transform_indices = @transform_2, window_bounds = array<i64: 1, 4, 4, 32>}, {transform_indices = @transform_3, window_bounds = array<i64: 1, 4, 4, 32>}, {transform_indices = @transform_4, window_bounds = array<i64: 1, 3, 3, 32>}]} {
    %c0 = arith.constant 0 : index
    %c0_0 = arith.constant 0 : index
    %c0_1 = arith.constant 0 : index
    %c0_2 = arith.constant 0 : index
    %0 = vector.load %arg1[%c0, %c0_0, %c0_1, %c0_2] : memref<1x4x4x32xf32, #tpu.memory_space<vmem>>, vector<1x3x3x32xf32>
    %c0_3 = arith.constant 0 : index
    %c0_4 = arith.constant 0 : index
    %c1 = arith.constant 1 : index
    %c0_5 = arith.constant 0 : index
    %1 = vector.load %arg1[%c0_3, %c0_4, %c1, %c0_5] : memref<1x4x4x32xf32, #tpu.memory_space<vmem>>, vector<1x3x3x32xf32>
    %2 = arith.maximumf %0, %1 : vector<1x3x3x32xf32>
    %c0_6 = arith.constant 0 : index
    %c1_7 = arith.constant 1 : index
    %c0_8 = arith.constant 0 : index
    %c0_9 = arith.constant 0 : index
    %3 = vector.load %arg1[%c0_6, %c1_7, %c0_8, %c0_9] : memref<1x4x4x32xf32, #tpu.memory_space<vmem>>, vector<1x3x3x32xf32>
    %4 = arith.maximumf %2, %3 : vector<1x3x3x32xf32>
    %c0_10 = arith.constant 0 : index
    %c1_11 = arith.constant 1 : index
    %c1_12 = arith.constant 1 : index
    %c0_13 = arith.constant 0 : index
    %5 = vector.load %arg1[%c0_10, %c1_11, %c1_12, %c0_13] : memref<1x4x4x32xf32, #tpu.memory_space<vmem>>, vector<1x3x3x32xf32>
    %6 = arith.maximumf %4, %5 : vector<1x3x3x32xf32>
    %c0_14 = arith.constant 0 : index
    %c0_15 = arith.constant 0 : index
    %c0_16 = arith.constant 0 : index
    %c0_17 = arith.constant 0 : index
    %7 = vector.load %arg2[%c0_14, %c0_15, %c0_16, %c0_17] : memref<1x4x4x32xf32, #tpu.memory_space<vmem>>, vector<1x3x3x32xf32>
    %8 = arith.maximumf %6, %7 : vector<1x3x3x32xf32>
    %c0_18 = arith.constant 0 : index
    %c1_19 = arith.constant 1 : index
    %c0_20 = arith.constant 0 : index
    %c0_21 = arith.constant 0 : index
    %9 = vector.load %arg2[%c0_18, %c1_19, %c0_20, %c0_21] : memref<1x4x4x32xf32, #tpu.memory_space<vmem>>, vector<1x3x3x32xf32>
    %10 = arith.maximumf %8, %9 : vector<1x3x3x32xf32>
    %c0_22 = arith.constant 0 : index
    %c0_23 = arith.constant 0 : index
    %c0_24 = arith.constant 0 : index
    %c0_25 = arith.constant 0 : index
    %11 = vector.load %arg3[%c0_22, %c0_23, %c0_24, %c0_25] : memref<1x4x4x32xf32, #tpu.memory_space<vmem>>, vector<1x3x3x32xf32>
    %12 = arith.maximumf %10, %11 : vector<1x3x3x32xf32>
    %c0_26 = arith.constant 0 : index
    %c0_27 = arith.constant 0 : index
    %c1_28 = arith.constant 1 : index
    %c0_29 = arith.constant 0 : index
    %13 = vector.load %arg3[%c0_26, %c0_27, %c1_28, %c0_29] : memref<1x4x4x32xf32, #tpu.memory_space<vmem>>, vector<1x3x3x32xf32>
    %14 = arith.maximumf %12, %13 : vector<1x3x3x32xf32>
    %c0_30 = arith.constant 0 : index
    %c0_31 = arith.constant 0 : index
    %c0_32 = arith.constant 0 : index
    %c0_33 = arith.constant 0 : index
    %15 = vector.load %arg4[%c0_30, %c0_31, %c0_32, %c0_33] : memref<1x4x4x32xf32, #tpu.memory_space<vmem>>, vector<1x3x3x32xf32>
    %16 = arith.maximumf %14, %15 : vector<1x3x3x32xf32>
    %c0_34 = arith.constant 0 : index
    %c0_35 = arith.constant 0 : index
    %c0_36 = arith.constant 0 : index
    %c0_37 = arith.constant 0 : index
    %17 = vector.load %arg5[%c0_34, %c0_35, %c0_36, %c0_37] : memref<1x3x3x32xf32, #tpu.memory_space<vmem>>, vector<1x3x3x32xf32>
    tpu.vector_store %arg5[%c0_34, %c0_35, %c0_36, %c0_37], %16 {strides = array<i32>} : memref<1x3x3x32xf32, #tpu.memory_space<vmem>>, vector<1x3x3x32xf32>,
    return
  }
  func.func @transform_0(%arg0: i32) -> (i32, i32, i32, i32) {
    %c0_i32 = arith.constant 0 : i32
    %c0_i32_0 = arith.constant 0 : i32
    %c0_i32_1 = arith.constant 0 : i32
    %c0_i32_2 = arith.constant 0 : i32
    return %arg0, %c0_i32, %c0_i32_0, %c0_i32_1 : i32, i32, i32, i32
  }
  func.func @transform_1(%arg0: i32) -> (i32, i32, i32, i32) {
    %c0_i32 = arith.constant 0 : i32
    %c0_i32_0 = arith.constant 0 : i32
    %c0_i32_1 = arith.constant 0 : i32
    %c0_i32_2 = arith.constant 0 : i32
    return %arg0, %c0_i32, %c0_i32_0, %c0_i32_1 : i32, i32, i32, i32
  }
  func.func @transform_2(%arg0: i32) -> (i32, i32, i32, i32) {
    %c0_i32 = arith.constant 0 : i32
    %c0_i32_0 = arith.constant 0 : i32
    %c0_i32_1 = arith.constant 0 : i32
    %c0_i32_2 = arith.constant 0 : i32
    return %arg0, %c0_i32, %c0_i32_0, %c0_i32_1 : i32, i32, i32, i32
  }
  func.func @transform_3(%arg0: i32) -> (i32, i32, i32, i32) {
    %c0_i32 = arith.constant 0 : i32
    %c0_i32_0 = arith.constant 0 : i32
    %c0_i32_1 = arith.constant 0 : i32
    %c0_i32_2 = arith.constant 0 : i32
    return %arg0, %c0_i32, %c0_i32_0, %c0_i32_1 : i32, i32, i32, i32
  }
  func.func @transform_4(%arg0: i32) -> (i32, i32, i32, i32) {
    %c0_i32 = arith.constant 0 : i32
    %c0_i32_0 = arith.constant 0 : i32
    %c0_i32_1 = arith.constant 0 : i32
    %c0_i32_2 = arith.constant 0 : i32
    return %arg0, %c0_i32, %c0_i32_0, %c0_i32_1 : i32, i32, i32, i32
  }
}

module attributes {stable_mosaic.version = 11 : i64} {
  func.func @_conv_mm_kernel(%arg0: i32, %arg1: memref<24x384xbf16, #tpu.memory_space<vmem>>, %arg2: memref<384x128xbf16, #tpu.memory_space<vmem>>, %arg3: memref<1x128xf32, #tpu.memory_space<vmem>>, %arg4: memref<24x128xf32, #tpu.memory_space<vmem>>) attributes {dimension_semantics = [#tpu.dimension_semantics<parallel>], iteration_bounds = array<i64: 1>, scalar_prefetch = 0 : i64, scratch_operands = 0 : i64, tpu.core_type = #tpu.core_type<tc>, window_params = [{transform_indices = @transform_0, window_bounds = array<i64: 24, 384>}, {pipeline_mode = #tpu.pipeline_mode<synchronous>, transform_indices = @transform_1, window_bounds = array<i64: 384, 128>}, {pipeline_mode = #tpu.pipeline_mode<synchronous>, transform_indices = @transform_2, window_bounds = array<i64: 1, 128>}, {transform_indices = @transform_3, window_bounds = array<i64: 24, 128>}]} {
    %c0 = arith.constant 0 : index
    %c0_0 = arith.constant 0 : index
    %0 = vector.load %arg1[%c0, %c0_0] : memref<24x384xbf16, #tpu.memory_space<vmem>>, vector<24x384xbf16>
    %c0_1 = arith.constant 0 : index
    %c0_2 = arith.constant 0 : index
    %1 = vector.load %arg2[%c0_1, %c0_2] : memref<384x128xbf16, #tpu.memory_space<vmem>>, vector<384x128xbf16>
    %cst = arith.constant dense<0.000000e+00> : vector<24x128xf32>
    %2 = tpu.matmul %0, %1, %cst {dimension_numbers = #tpu.dot_dimension_numbers<[1], [0], [0], [1], [0, 0, 1, 1], [], []>} : vector<24x384xbf16>, vector<384x128xbf16>, vector<24x128xf32> -> vector<24x128xf32>
    %c0_3 = arith.constant 0 : index
    %c0_4 = arith.constant 0 : index
    %3 = vector.load %arg3[%c0_3, %c0_4] : memref<1x128xf32, #tpu.memory_space<vmem>>, vector<1x128xf32>
    %4 = vector.broadcast %3 : vector<1x128xf32> to vector<24x128xf32>
    %5 = arith.addf %2, %4 : vector<24x128xf32>
    %cst_5 = arith.constant 0.000000e+00 : f32
    %6 = vector.broadcast %cst_5 : f32 to vector<24x128xf32>
    %7 = arith.maximumf %5, %6 : vector<24x128xf32>
    %c0_6 = arith.constant 0 : index
    %c0_7 = arith.constant 0 : index
    %8 = vector.load %arg4[%c0_6, %c0_7] : memref<24x128xf32, #tpu.memory_space<vmem>>, vector<24x128xf32>
    tpu.vector_store %arg4[%c0_6, %c0_7], %7 {strides = array<i32>} : memref<24x128xf32, #tpu.memory_space<vmem>>, vector<24x128xf32>,
    return
  }
  func.func @transform_0(%arg0: i32) -> (i32, i32) {
    %c0_i32 = arith.constant 0 : i32
    %c0_i32_0 = arith.constant 0 : i32
    return %arg0, %c0_i32 : i32, i32
  }
  func.func @transform_1(%arg0: i32) -> (i32, i32) {
    %c0_i32 = arith.constant 0 : i32
    %c0_i32_0 = arith.constant 0 : i32
    %c0_i32_1 = arith.constant 0 : i32
    return %c0_i32, %c0_i32_0 : i32, i32
  }
  func.func @transform_2(%arg0: i32) -> (i32, i32) {
    %c0_i32 = arith.constant 0 : i32
    %c0_i32_0 = arith.constant 0 : i32
    %c0_i32_1 = arith.constant 0 : i32
    return %c0_i32, %c0_i32_0 : i32, i32
  }
  func.func @transform_3(%arg0: i32) -> (i32, i32) {
    %c0_i32 = arith.constant 0 : i32
    %c0_i32_0 = arith.constant 0 : i32
    return %arg0, %c0_i32 : i32, i32
  }
}

module attributes {stable_mosaic.version = 11 : i64} {
  func.func @_conv_mm_kernel(%arg0: i32, %arg1: memref<24x512xbf16, #tpu.memory_space<vmem>>, %arg2: memref<512x128xbf16, #tpu.memory_space<vmem>>, %arg3: memref<1x128xf32, #tpu.memory_space<vmem>>, %arg4: memref<24x128xf32, #tpu.memory_space<vmem>>) attributes {dimension_semantics = [#tpu.dimension_semantics<parallel>], iteration_bounds = array<i64: 1>, scalar_prefetch = 0 : i64, scratch_operands = 0 : i64, tpu.core_type = #tpu.core_type<tc>, window_params = [{transform_indices = @transform_0, window_bounds = array<i64: 24, 512>}, {pipeline_mode = #tpu.pipeline_mode<synchronous>, transform_indices = @transform_1, window_bounds = array<i64: 512, 128>}, {pipeline_mode = #tpu.pipeline_mode<synchronous>, transform_indices = @transform_2, window_bounds = array<i64: 1, 128>}, {transform_indices = @transform_3, window_bounds = array<i64: 24, 128>}]} {
    %c0 = arith.constant 0 : index
    %c0_0 = arith.constant 0 : index
    %0 = vector.load %arg1[%c0, %c0_0] : memref<24x512xbf16, #tpu.memory_space<vmem>>, vector<24x512xbf16>
    %c0_1 = arith.constant 0 : index
    %c0_2 = arith.constant 0 : index
    %1 = vector.load %arg2[%c0_1, %c0_2] : memref<512x128xbf16, #tpu.memory_space<vmem>>, vector<512x128xbf16>
    %cst = arith.constant dense<0.000000e+00> : vector<24x128xf32>
    %2 = tpu.matmul %0, %1, %cst {dimension_numbers = #tpu.dot_dimension_numbers<[1], [0], [0], [1], [0, 0, 1, 1], [], []>} : vector<24x512xbf16>, vector<512x128xbf16>, vector<24x128xf32> -> vector<24x128xf32>
    %c0_3 = arith.constant 0 : index
    %c0_4 = arith.constant 0 : index
    %3 = vector.load %arg3[%c0_3, %c0_4] : memref<1x128xf32, #tpu.memory_space<vmem>>, vector<1x128xf32>
    %4 = vector.broadcast %3 : vector<1x128xf32> to vector<24x128xf32>
    %5 = arith.addf %2, %4 : vector<24x128xf32>
    %cst_5 = arith.constant 0.000000e+00 : f32
    %6 = vector.broadcast %cst_5 : f32 to vector<24x128xf32>
    %7 = arith.maximumf %5, %6 : vector<24x128xf32>
    %c0_6 = arith.constant 0 : index
    %c0_7 = arith.constant 0 : index
    %8 = vector.load %arg4[%c0_6, %c0_7] : memref<24x128xf32, #tpu.memory_space<vmem>>, vector<24x128xf32>
    tpu.vector_store %arg4[%c0_6, %c0_7], %7 {strides = array<i32>} : memref<24x128xf32, #tpu.memory_space<vmem>>, vector<24x128xf32>,
    return
  }
  func.func @transform_0(%arg0: i32) -> (i32, i32) {
    %c0_i32 = arith.constant 0 : i32
    %c0_i32_0 = arith.constant 0 : i32
    return %arg0, %c0_i32 : i32, i32
  }
  func.func @transform_1(%arg0: i32) -> (i32, i32) {
    %c0_i32 = arith.constant 0 : i32
    %c0_i32_0 = arith.constant 0 : i32
    %c0_i32_1 = arith.constant 0 : i32
    return %c0_i32, %c0_i32_0 : i32, i32
  }
  func.func @transform_2(%arg0: i32) -> (i32, i32) {
    %c0_i32 = arith.constant 0 : i32
    %c0_i32_0 = arith.constant 0 : i32
    %c0_i32_1 = arith.constant 0 : i32
    return %c0_i32, %c0_i32_0 : i32, i32
  }
  func.func @transform_3(%arg0: i32) -> (i32, i32) {
    %c0_i32 = arith.constant 0 : i32
    %c0_i32_0 = arith.constant 0 : i32
    return %arg0, %c0_i32 : i32, i32
  }
}

module attributes {stable_mosaic.version = 11 : i64} {
  func.func @_maxpool3x3s2_kernel(%arg0: i32, %arg1: memref<1x2x2x32xf32, #tpu.memory_space<vmem>>, %arg2: memref<1x2x2x32xf32, #tpu.memory_space<vmem>>, %arg3: memref<1x2x2x32xf32, #tpu.memory_space<vmem>>, %arg4: memref<1x2x2x32xf32, #tpu.memory_space<vmem>>, %arg5: memref<1x1x1x32xf32, #tpu.memory_space<vmem>>) attributes {dimension_semantics = [#tpu.dimension_semantics<parallel>], iteration_bounds = array<i64: 2>, scalar_prefetch = 0 : i64, scratch_operands = 0 : i64, tpu.core_type = #tpu.core_type<tc>, window_params = [{transform_indices = @transform_0, window_bounds = array<i64: 1, 2, 2, 32>}, {transform_indices = @transform_1, window_bounds = array<i64: 1, 2, 2, 32>}, {transform_indices = @transform_2, window_bounds = array<i64: 1, 2, 2, 32>}, {transform_indices = @transform_3, window_bounds = array<i64: 1, 2, 2, 32>}, {transform_indices = @transform_4, window_bounds = array<i64: 1, 1, 1, 32>}]} {
    %c0 = arith.constant 0 : index
    %c0_0 = arith.constant 0 : index
    %c0_1 = arith.constant 0 : index
    %c0_2 = arith.constant 0 : index
    %0 = vector.load %arg1[%c0, %c0_0, %c0_1, %c0_2] : memref<1x2x2x32xf32, #tpu.memory_space<vmem>>, vector<1x1x1x32xf32>
    %c0_3 = arith.constant 0 : index
    %c0_4 = arith.constant 0 : index
    %c1 = arith.constant 1 : index
    %c0_5 = arith.constant 0 : index
    %1 = vector.load %arg1[%c0_3, %c0_4, %c1, %c0_5] : memref<1x2x2x32xf32, #tpu.memory_space<vmem>>, vector<1x1x1x32xf32>
    %2 = arith.maximumf %0, %1 : vector<1x1x1x32xf32>
    %c0_6 = arith.constant 0 : index
    %c1_7 = arith.constant 1 : index
    %c0_8 = arith.constant 0 : index
    %c0_9 = arith.constant 0 : index
    %3 = vector.load %arg1[%c0_6, %c1_7, %c0_8, %c0_9] : memref<1x2x2x32xf32, #tpu.memory_space<vmem>>, vector<1x1x1x32xf32>
    %4 = arith.maximumf %2, %3 : vector<1x1x1x32xf32>
    %c0_10 = arith.constant 0 : index
    %c1_11 = arith.constant 1 : index
    %c1_12 = arith.constant 1 : index
    %c0_13 = arith.constant 0 : index
    %5 = vector.load %arg1[%c0_10, %c1_11, %c1_12, %c0_13] : memref<1x2x2x32xf32, #tpu.memory_space<vmem>>, vector<1x1x1x32xf32>
    %6 = arith.maximumf %4, %5 : vector<1x1x1x32xf32>
    %c0_14 = arith.constant 0 : index
    %c0_15 = arith.constant 0 : index
    %c0_16 = arith.constant 0 : index
    %c0_17 = arith.constant 0 : index
    %7 = vector.load %arg2[%c0_14, %c0_15, %c0_16, %c0_17] : memref<1x2x2x32xf32, #tpu.memory_space<vmem>>, vector<1x1x1x32xf32>
    %8 = arith.maximumf %6, %7 : vector<1x1x1x32xf32>
    %c0_18 = arith.constant 0 : index
    %c1_19 = arith.constant 1 : index
    %c0_20 = arith.constant 0 : index
    %c0_21 = arith.constant 0 : index
    %9 = vector.load %arg2[%c0_18, %c1_19, %c0_20, %c0_21] : memref<1x2x2x32xf32, #tpu.memory_space<vmem>>, vector<1x1x1x32xf32>
    %10 = arith.maximumf %8, %9 : vector<1x1x1x32xf32>
    %c0_22 = arith.constant 0 : index
    %c0_23 = arith.constant 0 : index
    %c0_24 = arith.constant 0 : index
    %c0_25 = arith.constant 0 : index
    %11 = vector.load %arg3[%c0_22, %c0_23, %c0_24, %c0_25] : memref<1x2x2x32xf32, #tpu.memory_space<vmem>>, vector<1x1x1x32xf32>
    %12 = arith.maximumf %10, %11 : vector<1x1x1x32xf32>
    %c0_26 = arith.constant 0 : index
    %c0_27 = arith.constant 0 : index
    %c1_28 = arith.constant 1 : index
    %c0_29 = arith.constant 0 : index
    %13 = vector.load %arg3[%c0_26, %c0_27, %c1_28, %c0_29] : memref<1x2x2x32xf32, #tpu.memory_space<vmem>>, vector<1x1x1x32xf32>
    %14 = arith.maximumf %12, %13 : vector<1x1x1x32xf32>
    %c0_30 = arith.constant 0 : index
    %c0_31 = arith.constant 0 : index
    %c0_32 = arith.constant 0 : index
    %c0_33 = arith.constant 0 : index
    %15 = vector.load %arg4[%c0_30, %c0_31, %c0_32, %c0_33] : memref<1x2x2x32xf32, #tpu.memory_space<vmem>>, vector<1x1x1x32xf32>
    %16 = arith.maximumf %14, %15 : vector<1x1x1x32xf32>
    %c0_34 = arith.constant 0 : index
    %c0_35 = arith.constant 0 : index
    %c0_36 = arith.constant 0 : index
    %c0_37 = arith.constant 0 : index
    %17 = vector.load %arg5[%c0_34, %c0_35, %c0_36, %c0_37] : memref<1x1x1x32xf32, #tpu.memory_space<vmem>>, vector<1x1x1x32xf32>
    tpu.vector_store %arg5[%c0_34, %c0_35, %c0_36, %c0_37], %16 {strides = array<i32>} : memref<1x1x1x32xf32, #tpu.memory_space<vmem>>, vector<1x1x1x32xf32>,
    return
  }
  func.func @transform_0(%arg0: i32) -> (i32, i32, i32, i32) {
    %c0_i32 = arith.constant 0 : i32
    %c0_i32_0 = arith.constant 0 : i32
    %c0_i32_1 = arith.constant 0 : i32
    %c0_i32_2 = arith.constant 0 : i32
    return %arg0, %c0_i32, %c0_i32_0, %c0_i32_1 : i32, i32, i32, i32
  }
  func.func @transform_1(%arg0: i32) -> (i32, i32, i32, i32) {
    %c0_i32 = arith.constant 0 : i32
    %c0_i32_0 = arith.constant 0 : i32
    %c0_i32_1 = arith.constant 0 : i32
    %c0_i32_2 = arith.constant 0 : i32
    return %arg0, %c0_i32, %c0_i32_0, %c0_i32_1 : i32, i32, i32, i32
  }
  func.func @transform_2(%arg0: i32) -> (i32, i32, i32, i32) {
    %c0_i32 = arith.constant 0 : i32
    %c0_i32_0 = arith.constant 0 : i32
    %c0_i32_1 = arith.constant 0 : i32
    %c0_i32_2 = arith.constant 0 : i32
    return %arg0, %c0_i32, %c0_i32_0, %c0_i32_1 : i32, i32, i32, i32
  }
  func.func @transform_3(%arg0: i32) -> (i32, i32, i32, i32) {
    %c0_i32 = arith.constant 0 : i32
    %c0_i32_0 = arith.constant 0 : i32
    %c0_i32_1 = arith.constant 0 : i32
    %c0_i32_2 = arith.constant 0 : i32
    return %arg0, %c0_i32, %c0_i32_0, %c0_i32_1 : i32, i32, i32, i32
  }
  func.func @transform_4(%arg0: i32) -> (i32, i32, i32, i32) {
    %c0_i32 = arith.constant 0 : i32
    %c0_i32_0 = arith.constant 0 : i32
    %c0_i32_1 = arith.constant 0 : i32
    %c0_i32_2 = arith.constant 0 : i32
    return %arg0, %c0_i32, %c0_i32_0, %c0_i32_1 : i32, i32, i32, i32
  }
}

</mosaic_0001>

<bundles_post_ra>
// kernel: alex_bottom_forward.8
= control target key start
LH: loop header
LB: loop body
LE: loop exit
PB: predicated region body
PF: predicated region fallthrough
CT: control target
= control target key end

     0   :  { %s1548_s12 = smov 0   ;;  %s1792_s0 = inlined_call_operand.vmem [shape: bf16[512,384], index: 0, kind: input, shape index: {}]   ;;  %s1793_s1 = inlined_call_operand.vmem [shape: bf16[384,128], index: 1, kind: input, shape index: {}]   ;;  %s1794_s2 = inlined_call_operand.vmem [shape: f32[1,128], index: 2, kind: input, shape index: {}]   ;;  %s1795_s3 = inlined_call_operand.vmem [shape: f32[512,128], index: 3, kind: output, shape index: {}]  }
   0x1 LB: > { %s1139_s13 = sadd.s32 4294967295, %s1526_s12   ;;  %p1143_p0 = scmp.ge.s32.totalorder %s1526_s12, 1  ;;  %s1526_s12 = sphi %s1548_s12, %s13_s12  }
   0x2   : > { %p139_p1 = scmp.lt.s32.totalorder %s1526_s12, 3 }
   0x4   : > { %p140_p2 = pnand %p1143_p0, %p139_p1 }
   0x5   : > { %v1432_v0 = vld [vmem:[%s1793_s1 + $0x40] sm:$0xff] (!%p140_p2)   ;;  %s1144_s16 = sshll.u32 (!%p140_p2), %s1139_s13, 5  ;;  %v1434_v2 = vld [vmem:[%s1793_s1 + $0x48] sm:$0xff] (!%p140_p2)   ;;  %v1436_v4 = vld [vmem:[%s1793_s1 + $0x50] sm:$0xff] (!%p140_p2)  }
   0x6   : > { %143 = sbr.rel (%p140_p2) target bundleno = 350 (0x15e), region = 32  ;;  %v1433_v1 = vld [vmem:[%s1793_s1] sm:$0xff] (!%p140_p2)   ;;  %1223 = vmatprep.subr.bf16.mxu0 (!%p140_p2), %v1432_v0  ;;  %1407 = vmatprep.subr.bf16.mxu1 (!%p140_p2), %v1432_v0  ;;  %p165_p3 = scmp.lt.s32.totalorder (!%p140_p2), %s1144_s16, 63  ;;  %v1435_v3 = vld [vmem:[%s1793_s1 + $0x8] sm:$0xff] (!%p140_p2)   ;;  %v1437_v5 = vld [vmem:[%s1793_s1 + $0x10] sm:$0xff] (!%p140_p2)  }
   0x7   : > { %1224 = vmatpush3.bf16.msra.mxu0 (!%p140_p2), %v1433_v1  ;;  %1415 = vmatpush3.bf16.msra.mxu1 (!%p140_p2), %v1433_v1  ;;  %v1438_v6 = vld [vmem:[%s1793_s1 + $0x58] sm:$0xff] (!%p140_p2)   ;;  %v1440_v8 = vld [vmem:[%s1793_s1 + $0x60] sm:$0xff] (!%p140_p2)   ;;  %v1442_v10 = vld [vmem:[%s1793_s1 + $0x68] sm:$0xff] (!%p140_p2)  }
   0x8   : > { %1225 = vmatprep.subr.bf16.mxu0 (!%p140_p2), %v1434_v2  ;;  %1408 = vmatprep.subr.bf16.mxu1 (!%p140_p2), %v1434_v2  ;;  %v1439_v7 = vld [vmem:[%s1793_s1 + $0x18] sm:$0xff] (!%p140_p2)   ;;  %v1441_v9 = vld [vmem:[%s1793_s1 + $0x20] sm:$0xff] (!%p140_p2)   ;;  %v1443_v13 = vld [vmem:[%s1793_s1 + $0x28] sm:$0xff] (!%p140_p2)  }
   0x9   : > { %v1444_v14 = vld [vmem:[%s1793_s1 + $0x70] sm:$0xff] (!%p140_p2)   ;;  %v1446_v16 = vld [vmem:[%s1793_s1 + $0x78] sm:$0xff] (!%p140_p2)   ;;  %v1454_v18 = vld [vmem:[%s1793_s1 + $0x80] sm:$0xff] (!%p140_p2)  }
   0xa   : > { %v1445_v15 = vld [vmem:[%s1793_s1 + $0x30] sm:$0xff] (!%p140_p2)   ;;  %v1447_v17 = vld [vmem:[%s1793_s1 + $0x38] sm:$0xff] (!%p140_p2)   ;;  %v1455_v22 = vld [vmem:[%s1793_s1 + $0x88] sm:$0xff] (!%p140_p2)  }
   0xb   : > { %1226 = vmatpush3.bf16.msra.mxu0 (!%p140_p2), %v1435_v3  ;;  %1416 = vmatpush3.bf16.msra.mxu1 (!%p140_p2), %v1435_v3  ;;  %v1462_v25 = vld [vmem:[%s1793_s1 + $0x90] sm:$0xff] (!%p140_p2)   ;;  %v1463_v27 = vld [vmem:[%s1793_s1 + $0x98] sm:$0xff] (!%p140_p2)   ;;  %v1470_v30 = vld [vmem:[%s1793_s1 + $0xa0] sm:$0xff] (!%p140_p2)  }
   0xc   : > { %1227 = vmatprep.subr.bf16.mxu0 (!%p140_p2), %v1436_v4  ;;  %1409 = vmatprep.subr.bf16.mxu1 (!%p140_p2), %v1436_v4  ;;  %v1471_v33 = vld [vmem:[%s1793_s1 + $0xa8] sm:$0xff] (!%p140_p2)   ;;  %v1478_v36 = vld [vmem:[%s1793_s1 + $0xb0] sm:$0xff] (!%p140_p2)   ;;  %v1479_v40 = vld [vmem:[%s1793_s1 + $0xb8] sm:$0xff] (!%p140_p2)  }
   0xd   : > { %s1797_s16 = smov (!%p165_p3, %s1144_s16), 63 }
   0xe   : > { %s1423_s29 = smul.u32 12, %s1797_s16  ;;  %s1147_s19 = sshll.u32 %s1797_s16, 3 }
   0xf   : > { %1228 = vmatpush3.bf16.msra.mxu0 %v1437_v5  ;;  %1417 = vmatpush3.bf16.msra.mxu1 %v1437_v5  ;;  %s1712_s22 = scalar_lea.vmem %s1795_s3, %s1147_s19 }
  0x10   : > { %1229 = vmatprep.subr.bf16.mxu0 %v1438_v6  ;;  %1410 = vmatprep.subr.bf16.mxu1 %v1438_v6  ;;  %s1589_s9 = scalar_lea.vmem %s1792_s0, %s1423_s29 }
  0x11   : > { %v1450_v11 = vld [vmem:[%s1589_s9 + $0x4] ss:$12 sps:$4 sm:$0xff]   ;;  %v1448_v19 = vld [vmem:[%s1589_s9] ss:$12 sps:$4 sm:$0xff]   ;;  %v1456_v21 = vld [vmem:[%s1589_s9 + $0x1c] ss:$12 sps:$4 sm:$0xff]  }
  0x12   : > { %v1453_v12 = vld [vmem:[%s1589_s9 + $0x124] ss:$12 sps:$4 sm:$0xff]   ;;  %729 = vmatprep.mubr.bf16.mxu0 %v1450_v11  ;;  %v1451_v20 = vld [vmem:[%s1589_s9 + $0x120] ss:$12 sps:$4 sm:$0xff]   ;;  %v1458_v23 = vld [vmem:[%s1589_s9 + $0x13c] ss:$12 sps:$4 sm:$0xff]  }
  0x13   : > { %1230 = vmatpush3.bf16.msra.mxu0 %v1439_v7  ;;  %1418 = vmatpush3.bf16.msra.mxu1 %v1439_v7  ;;  %v1460_v24 = vld [vmem:[%s1589_s9 + $0x18] ss:$12 sps:$4 sm:$0xff]   ;;  %v1464_v28 = vld [vmem:[%s1589_s9 + $0x34] ss:$12 sps:$4 sm:$0xff]   ;;  %v1468_v31 = vld [vmem:[%s1589_s9 + $0x30] ss:$12 sps:$4 sm:$0xff]  }
  0x14   : > { %1231 = vmatprep.subr.bf16.mxu0 %v1440_v8  ;;  %1411 = vmatprep.subr.bf16.mxu1 %v1440_v8  ;;  %v1461_v26 = vld [vmem:[%s1589_s9 + $0x138] ss:$12 sps:$4 sm:$0xff]   ;;  %v1466_v29 = vld [vmem:[%s1589_s9 + $0x154] ss:$12 sps:$4 sm:$0xff]   ;;  %v1469_v32 = vld [vmem:[%s1589_s9 + $0x150] ss:$12 sps:$4 sm:$0xff]  }
  0x15   : > { %825 = vmatprep.mubr.bf16.mxu1 %v1453_v12  ;;  %v1472_v34 = vld [vmem:[%s1589_s9 + $0x4c] ss:$12 sps:$4 sm:$0xff]   ;;  %v1476_v37 = vld [vmem:[%s1589_s9 + $0x48] ss:$12 sps:$4 sm:$0xff]   ;;  %v1480_v39 = vld [vmem:[%s1589_s9 + $0x64] ss:$12 sps:$4 sm:$0xff]  }
  0x16   : > { %v1474_v35 = vld [vmem:[%s1589_s9 + $0x16c] ss:$12 sps:$4 sm:$0xff]   ;;  %v1477_v38 = vld [vmem:[%s1589_s9 + $0x168] ss:$12 sps:$4 sm:$0xff]   ;;  %v1489_v47 = vld [vmem:[%s1589_s9 + $0x50] ss:$12 sps:$4 sm:$0xff]  }
  0x17   : > { %1232 = vmatpush3.bf16.msra.mxu0 %v1441_v9  ;;  %1419 = vmatpush3.bf16.msra.mxu1 %v1441_v9  ;;  %v1482_v41 = vld [vmem:[%s1589_s9 + $0x8] ss:$12 sps:$4 sm:$0xff]   ;;  %v1483_v42 = vld [vmem:[%s1589_s9 + $0x60] ss:$12 sps:$4 sm:$0xff]   ;;  %v1487_v45 = vld [vmem:[%s1589_s9 + $0x38] ss:$12 sps:$4 sm:$0xff]  }
  0x18   : > { %1233 = vmatprep.subr.bf16.mxu0 %v1442_v10  ;;  %1412 = vmatprep.subr.bf16.mxu1 %v1442_v10  ;;  %v1484_v43 = vld [vmem:[%s1589_s9 + $0x20] ss:$12 sps:$4 sm:$0xff]   ;;  %v1485_v44 = vld [vmem:[%s1589_s9 + $0x7c] ss:$12 sps:$4 sm:$0xff]   ;;  %v1488_v46 = vld [vmem:[%s1589_s9 + $0x78] ss:$12 sps:$4 sm:$0xff]  }
  0x19   : > { %v1490_v48 = vld [vmem:[%s1589_s9 + $0x94] ss:$12 sps:$4 sm:$0xff]   ;;  %v1493_v50 = vld [vmem:[%s1589_s9 + $0x90] ss:$12 sps:$4 sm:$0xff]   ;;  %v1495_v52 = vld [vmem:[%s1589_s9 + $0xac] ss:$12 sps:$4 sm:$0xff]  }
  0x1a   : > { %v1492_v49 = vld [vmem:[%s1589_s9 + $0x68] ss:$12 sps:$4 sm:$0xff]   ;;  %v1494_v51 = vld [vmem:[%s1589_s9 + $0x80] ss:$12 sps:$4 sm:$0xff]   ;;  %v1497_v53 = vld [vmem:[%s1589_s9 + $0x98] ss:$12 sps:$4 sm:$0xff]  }
  0x1b   : > { %1234 = vmatpush3.bf16.msra.mxu0 %v1443_v13  ;;  %1420 = vmatpush3.bf16.msra.mxu1 %v1443_v13  ;;  %v1498_v54 = vld [vmem:[%s1589_s9 + $0xa8] ss:$12 sps:$4 sm:$0xff]   ;;  %v1499_v55 = vld [vmem:[%s1589_s9 + $0xb0] ss:$12 sps:$4 sm:$0xff]   ;;  %v1503_v58 = vld [vmem:[%s1589_s9 + $0xc0] ss:$12 sps:$4 sm:$0xff]  }
  0x1c   : > { %1235 = vmatprep.subr.bf16.mxu0 %v1444_v14  ;;  %1413 = vmatprep.subr.bf16.mxu1 %v1444_v14  ;;  %v1500_v56 = vld [vmem:[%s1589_s9 + $0xc4] ss:$12 sps:$4 sm:$0xff]   ;;  %v1502_v57 = vld [vmem:[%s1589_s9 + $0xc8] ss:$12 sps:$4 sm:$0xff]   ;;  %v1504_v59 = vld [vmem:[%s1589_s9 + $0xe0] ss:$12 sps:$4 sm:$0xff]  }
  0x1d   : > { %v1505_v60 = vld [vmem:[%s1589_s9 + $0xdc] ss:$12 sps:$4 sm:$0xff]   ;;  %v1507_v61 = vld [vmem:[%s1589_s9 + $0xf8] ss:$12 sps:$4 sm:$0xff]   ;;  %v1510_v0 = vld [vmem:[%s1589_s9 + $0xf4] ss:$12 sps:$4 sm:$0xff]  }
  0x1e   : > { %v1508_v62 = vld [vmem:[%s1589_s9 + $0xd8] ss:$12 sps:$4 sm:$0xff]   ;;  %v1509_v63 = vld [vmem:[%s1589_s9 + $0x110] ss:$12 sps:$4 sm:$0xff]   ;;  %v1512_v1 = vld [vmem:[%s1589_s9 + $0x128] ss:$12 sps:$4 sm:$0xff]  }
  0x1f   : > { %1236 = vmatpush3.bf16.msra.mxu0 %v1445_v15  ;;  %1421 = vmatpush3.bf16.msra.mxu1 %v1445_v15  ;;  %v1513_v2 = vld [vmem:[%s1589_s9 + $0xf0] ss:$12 sps:$4 sm:$0xff]   ;;  %v1514_v3 = vld [vmem:[%s1589_s9 + $0x140] ss:$12 sps:$4 sm:$0xff]   ;;  %v1517_v5 = vld [vmem:[%s1589_s9 + $0x158] ss:$12 sps:$4 sm:$0xff]  }
  0x20   : > { %1237 = vmatprep.subr.bf16.mxu0 %v1446_v16  ;;  %1414 = vmatprep.subr.bf16.mxu1 %v1446_v16  ;;  %v1515_v4 = vld [vmem:[%s1589_s9 + $0x10c] ss:$12 sps:$4 sm:$0xff]   ;;  %v1518_v6 = vld [vmem:[%s1589_s9 + $0x108] ss:$12 sps:$4 sm:$0xff]   ;;  %v1519_v7 = vld [vmem:[%s1589_s9 + $0x170] ss:$12 sps:$4 sm:$0xff]  }
  0x23   : > { %1238 = vmatpush3.bf16.msra.mxu0 %v1447_v17  ;;  %1422 = vmatpush3.bf16.msra.mxu1 %v1447_v17 }
  0x24   : > { %1359 = vmatprep.subr.bf16.mxu1 %v1454_v18 }
  0x26   : > { %730 = vmatmul.mubr.bf16.vlgmr.msra.gmra.mrb[0].mxu0 %v1448_v19  ;;  %826 = vmatmul.mubr.bf16.vlgmr.msra.gmra.mrb[0].mxu1 %v1451_v20 }
  0x27   : > { %1360 = vmatpush3.bf16.msra.mxu1 %v1454_v18  ;;  %737 = vmatprep.mubr.bf16.mxu0 %v1456_v21 }
  0x28   : > { %1361 = vmatprep.subr.bf16.mxu1 %v1455_v22  ;;  %833 = vmatprep.mubr.bf16.mxu1 %v1458_v23 }
  0x2b   : > { %1362 = vmatpush3.bf16.msra.mxu1 %v1455_v22 }
  0x2c   : > { %1363 = vmatprep.subr.bf16.mxu1 %v1462_v25 }
  0x2e   : > { %738 = vmatmul.mubr.bf16.gmra.mrb[4].mxu0 %v1460_v24  ;;  %834 = vmatmul.mubr.bf16.gmra.mrb[4].mxu1 %v1461_v26 }
  0x2f   : > { %1364 = vmatpush3.bf16.msra.mxu1 %v1462_v25  ;;  %745 = vmatprep.mubr.bf16.mxu0 %v1464_v28 }
  0x30   : > { %1365 = vmatprep.subr.bf16.mxu1 %v1463_v27  ;;  %841 = vmatprep.mubr.bf16.mxu1 %v1466_v29 }
  0x33   : > { %1366 = vmatpush3.bf16.msra.mxu1 %v1463_v27 }
  0x34   : > { %1367 = vmatprep.subr.bf16.mxu1 %v1470_v30 }
  0x36   : > { %746 = vmatmul.mubr.bf16.gmra.mrb[8].mxu0 %v1468_v31  ;;  %842 = vmatmul.mubr.bf16.gmra.mrb[8].mxu1 %v1469_v32 }
  0x37   : > { %1368 = vmatpush3.bf16.msra.mxu1 %v1470_v30  ;;  %753 = vmatprep.mubr.bf16.mxu0 %v1472_v34 }
  0x38   : > { %1369 = vmatprep.subr.bf16.mxu1 %v1471_v33  ;;  %849 = vmatprep.mubr.bf16.mxu1 %v1474_v35 }
  0x3b   : > { %1370 = vmatpush3.bf16.msra.mxu1 %v1471_v33 }
  0x3c   : > { %1371 = vmatprep.subr.bf16.mxu1 %v1478_v36 }
  0x3e   : > { %754 = vmatmul.mubr.bf16.gmra.mrb[12].mxu0 %v1476_v37  ;;  %850 = vmatmul.mubr.bf16.gmra.mrb[12].mxu1 %v1477_v38 }
  0x3f   : > { %1372 = vmatpush3.bf16.msra.mxu1 %v1478_v36  ;;  %761 = vmatprep.mubr.bf16.mxu0 %v1480_v39 }
  0x40   : > { %1373 = vmatprep.subr.bf16.mxu1 %v1479_v40  ;;  %1375 = vmatprep.mubr.bf16.mxu1 %v1482_v41 }
  0x43   : > { %1374 = vmatpush3.bf16.msra.mxu1 %v1479_v40 }
  0x46   : > { %762 = vmatmul.mubr.bf16.gmra.mrb[16].mxu0 %v1483_v42  ;;  %1376 = vmatmul.mubr.bf16.vlgmr.msra.gmra.mrb[16].mxu1 %v1484_v43 }
  0x47   : > { %769 = vmatprep.mubr.bf16.mxu0 %v1485_v44  ;;  %1379 = vmatprep.mubr.bf16.mxu1 %v1487_v45 }
  0x4e   : > { %770 = vmatmul.mubr.bf16.gmra.mrb[20].mxu0 %v1488_v46  ;;  %1380 = vmatmul.mubr.bf16.gmra.mrb[20].mxu1 %v1489_v47 }
  0x4f   : > { %777 = vmatprep.mubr.bf16.mxu0 %v1490_v48  ;;  %1383 = vmatprep.mubr.bf16.mxu1 %v1492_v49 }
  0x56   : > { %778 = vmatmul.mubr.bf16.gmra.mrb[24].mxu0 %v1493_v50  ;;  %1384 = vmatmul.mubr.bf16.gmra.mrb[24].mxu1 %v1494_v51 }
  0x57   : > { %785 = vmatprep.mubr.bf16.mxu0 %v1495_v52  ;;  %1387 = vmatprep.mubr.bf16.mxu1 %v1497_v53 }
  0x5e   : > { %786 = vmatmul.mubr.bf16.gmra.mrb[28].mxu0 %v1498_v54  ;;  %1388 = vmatmul.mubr.bf16.gmra.mrb[28].mxu1 %v1499_v55 }
  0x5f   : > { %793 = vmatprep.mubr.bf16.mxu0 %v1500_v56  ;;  %1391 = vmatprep.mubr.bf16.mxu1 %v1502_v57  ;;  %v1703_v56 = vld [vmem:[%s1794_s2] ss:$0 sm:$0xff] }
  0x66   : > { %794 = vmatmul.mubr.bf16.gmra.mrb[32].mxu0 %v1503_v58  ;;  %1392 = vmatmul.mubr.bf16.gmra.mrb[32].mxu1 %v1504_v59 }
  0x67   : > { %801 = vmatprep.mubr.bf16.mxu0 %v1505_v60  ;;  %1395 = vmatprep.mubr.bf16.mxu1 %v1507_v61 }
  0x6e   : > { %802 = vmatmul.mubr.bf16.gmra.mrb[36].mxu0 %v1508_v62  ;;  %1396 = vmatmul.mubr.bf16.gmra.mrb[36].mxu1 %v1509_v63 }
  0x6f   : > { %809 = vmatprep.mubr.bf16.mxu0 %v1510_v0  ;;  %1399 = vmatprep.mubr.bf16.mxu1 %v1512_v1 }
  0x76   : > { %810 = vmatmul.mubr.bf16.gmra.mrb[40].mxu0 %v1513_v2  ;;  %1400 = vmatmul.mubr.bf16.gmra.mrb[40].mxu1 %v1514_v3 }
  0x77   : > { %817 = vmatprep.mubr.bf16.mxu0 %v1515_v4  ;;  %1403 = vmatprep.mubr.bf16.mxu1 %v1517_v5 }
  0x7e   : > { %818 = vmatmul.mubr.bf16.gmra.mrb[44].mxu0 %v1518_v6  ;;  %1404 = vmatmul.mubr.bf16.gmra.mrb[44].mxu1 %v1519_v7 }
  0xf9   : > { %v1239_v8 = vpop.f32.mrb[0].mxu0  ;;  %v1311_v9 = vpop.f32.mrb[0].mxu1 }
  0xfa   : > { %v1240_v10 = vpop.f32.mrb[1].mxu0  ;;  %v1312_v11 = vpop.f32.mrb[1].mxu1 }
  0xfb   : > { %v1241_v12 = vadd.f32 %v1240_v10, %v1239_v8  ;;  %v1242_v13 = vpop.f32.mrb[2].mxu0  ;;  %v1684_v14 = vadd.f32 %v1312_v11, %v1311_v9  ;;  %v1314_v15 = vpop.f32.mrb[2].mxu1 }
  0xfc   : > { %v1243_v16 = vpop.f32.mrb[3].mxu0  ;;  %v1315_v17 = vpop.f32.mrb[3].mxu1 }
  0xfd   : > { %v1244_v18 = vadd.f32 %v1243_v16, %v1242_v13  ;;  %v1686_v19 = vadd.f32 %v1315_v17, %v1314_v15  ;;  %v732_v60 = vadd.f32 %v1241_v12, %v1703_v56 }
  0xff   : > { %v735_v5 = vadd.f32 %v1244_v18, %v1703_v56 }
 0x101   : > { %v1245_v20 = vpop.f32.mrb[4].mxu0  ;;  %v1317_v21 = vpop.f32.mrb[4].mxu1 }
 0x102   : > { %v1246_v22 = vpop.f32.mrb[5].mxu0  ;;  %v1318_v23 = vpop.f32.mrb[5].mxu1 }
 0x103   : > { %v1247_v24 = vadd.f32 %v1246_v22, %v1245_v20  ;;  %v1248_v25 = vpop.f32.mrb[6].mxu0  ;;  %v1688_v26 = vadd.f32 %v1318_v23, %v1317_v21  ;;  %v1320_v27 = vpop.f32.mrb[6].mxu1 }
 0x104   : > { %v1249_v28 = vpop.f32.mrb[7].mxu0  ;;  %v1321_v29 = vpop.f32.mrb[7].mxu1 }
 0x105   : > { %v1250_v30 = vadd.f32 %v1249_v28, %v1248_v25  ;;  %v1690_v31 = vadd.f32 %v1321_v29, %v1320_v27  ;;  %v740_v57 = vadd.f32 %v1247_v24, %v1703_v56 }
 0x107   : > { %v743_v0 = vadd.f32 %v1250_v30, %v1703_v56 }
 0x109   : > { %v1251_v32 = vpop.f32.mrb[8].mxu0  ;;  %v1323_v33 = vpop.f32.mrb[8].mxu1 }
 0x10a   : > { %v1252_v34 = vpop.f32.mrb[9].mxu0  ;;  %v1324_v35 = vpop.f32.mrb[9].mxu1 }
 0x10b   : > { %v1253_v36 = vadd.f32 %v1252_v34, %v1251_v32  ;;  %v1254_v37 = vpop.f32.mrb[10].mxu0  ;;  %v1692_v38 = vadd.f32 %v1324_v35, %v1323_v33  ;;  %v1326_v39 = vpop.f32.mrb[10].mxu1 }
 0x10c   : > { %v1255_v40 = vpop.f32.mrb[11].mxu0  ;;  %v1327_v41 = vpop.f32.mrb[11].mxu1 }
 0x10d   : > { %v1256_v42 = vadd.f32 %v1255_v40, %v1254_v37  ;;  %v1694_v43 = vadd.f32 %v1327_v41, %v1326_v39  ;;  %v748_v21 = vadd.f32 %v1253_v36, %v1703_v56 }
 0x10f   : > { %v751_v30 = vadd.f32 %v1256_v42, %v1703_v56 }
 0x111   : > { %v1257_v44 = vpop.f32.mrb[12].mxu0  ;;  %v1329_v45 = vpop.f32.mrb[12].mxu1 }
 0x112   : > { %v1258_v46 = vpop.f32.mrb[13].mxu0  ;;  %v1330_v47 = vpop.f32.mrb[13].mxu1 }
 0x113   : > { %v1259_v48 = vadd.f32 %v1258_v46, %v1257_v44  ;;  %v1260_v49 = vpop.f32.mrb[14].mxu0  ;;  %v1696_v50 = vadd.f32 %v1330_v47, %v1329_v45  ;;  %v1332_v51 = vpop.f32.mrb[14].mxu1 }
 0x114   : > { %v1261_v52 = vpop.f32.mrb[15].mxu0  ;;  %v1333_v53 = vpop.f32.mrb[15].mxu1 }
 0x115   : > { %v1262_v54 = vadd.f32 %v1261_v52, %v1260_v49  ;;  %v1698_v55 = vadd.f32 %v1333_v53, %v1332_v51  ;;  %v756_v16 = vadd.f32 %v1259_v48, %v1703_v56 }
 0x117   : > { %v759_v24 = vadd.f32 %v1262_v54, %v1703_v56 }
 0x119   : > { %v1263_v58 = vpop.f32.mrb[16].mxu0  ;;  %v1377_v59 = vpop.f32.mrb[16].mxu1 }
 0x11a   : > { %v901_v61 = vadd.f32 %v1377_v59, %v740_v57  ;;  %v1264_v62 = vpop.f32.mrb[17].mxu0  ;;  %v892_v63 = vpop.f32.mrb[17].mxu1 }
 0x11b   : > { %v1265_v1 = vadd.f32 %v1264_v62, %v1263_v58  ;;  %v893_v2 = vadd.f32 %v892_v63, %v732_v60  ;;  %v1266_v3 = vpop.f32.mrb[18].mxu0  ;;  %v1378_v4 = vpop.f32.mrb[18].mxu1 }
 0x11c   : > { %v1021_v6 = vmax.f32 %v901_v61, 0.0  ;;  %v904_v7 = vadd.f32 %v1378_v4, %v743_v0  ;;  %v1267_v8 = vpop.f32.mrb[19].mxu0  ;;  %v895_v9 = vpop.f32.mrb[19].mxu1 }
 0x11d   : > { %v1019_v10 = vmax.f32 %v893_v2, 0.0  ;;  %v1268_v11 = vadd.f32 %v1267_v8, %v1266_v3  ;;  %v896_v12 = vadd.f32 %v895_v9, %v735_v5  ;;  %v764_v47 = vadd.f32 %v1265_v1, %v1703_v56 }
 0x11e   : > { %1053 = vst [vmem:[%s1712_s22 + $0x10] sm:$0xff] %v1021_v6  ;;  %v1022_v13 = vmax.f32 %v904_v7, 0.0 }
 0x11f   : > { %1051 = vst [vmem:[%s1712_s22] sm:$0xff] %v1019_v10  ;;  %v1020_v15 = vmax.f32 %v896_v12, 0.0  ;;  %v767_v58 = vadd.f32 %v1268_v11, %v1703_v56 }
 0x120   : > { %1054 = vst [vmem:[%s1712_s22 + $0x18] sm:$0xff] %v1022_v13 }
 0x121   : > { %1052 = vst [vmem:[%s1712_s22 + $0x8] sm:$0xff] %v1020_v15  ;;  %v1269_v17 = vpop.f32.mrb[20].mxu0  ;;  %v1381_v20 = vpop.f32.mrb[20].mxu1 }
 0x122   : > { %v917_v18 = vadd.f32 %v1381_v20, %v756_v16  ;;  %v1270_v22 = vpop.f32.mrb[21].mxu0  ;;  %v908_v23 = vpop.f32.mrb[21].mxu1 }
 0x123   : > { %v1271_v25 = vadd.f32 %v1270_v22, %v1269_v17  ;;  %v909_v27 = vadd.f32 %v908_v23, %v748_v21  ;;  %v1272_v28 = vpop.f32.mrb[22].mxu0  ;;  %v1382_v29 = vpop.f32.mrb[22].mxu1 }
 0x124   : > { %v1025_v32 = vmax.f32 %v917_v18, 0.0  ;;  %v920_v33 = vadd.f32 %v1382_v29, %v759_v24  ;;  %v1273_v34 = vpop.f32.mrb[23].mxu0  ;;  %v911_v35 = vpop.f32.mrb[23].mxu1 }
 0x125   : > { %v1023_v36 = vmax.f32 %v909_v27, 0.0  ;;  %v1274_v37 = vadd.f32 %v1273_v34, %v1272_v28  ;;  %v912_v39 = vadd.f32 %v911_v35, %v751_v30  ;;  %v772_v44 = vadd.f32 %v1271_v25, %v1703_v56 }
 0x126   : > { %1057 = vst [vmem:[%s1712_s22 + $0x30] sm:$0xff] %v1025_v32  ;;  %v1026_v40 = vmax.f32 %v920_v33, 0.0 }
 0x127   : > { %1055 = vst [vmem:[%s1712_s22 + $0x20] sm:$0xff] %v1023_v36  ;;  %v1024_v41 = vmax.f32 %v912_v39, 0.0  ;;  %v775_v51 = vadd.f32 %v1274_v37, %v1703_v56 }
 0x128   : > { %1058 = vst [vmem:[%s1712_s22 + $0x38] sm:$0xff] %v1026_v40 }
 0x129   : > { %1056 = vst [vmem:[%s1712_s22 + $0x28] sm:$0xff] %v1024_v41  ;;  %v1275_v45 = vpop.f32.mrb[24].mxu0  ;;  %v1385_v46 = vpop.f32.mrb[24].mxu1 }
 0x12a   : > { %v933_v42 = vadd.f32 %v1385_v46, %v772_v44  ;;  %v1276_v48 = vpop.f32.mrb[25].mxu0  ;;  %v924_v49 = vpop.f32.mrb[25].mxu1 }
 0x12b   : > { %v1277_v52 = vadd.f32 %v1276_v48, %v1275_v45  ;;  %v925_v53 = vadd.f32 %v924_v49, %v764_v47  ;;  %v1278_v54 = vpop.f32.mrb[26].mxu0  ;;  %v1386_v57 = vpop.f32.mrb[26].mxu1 }
 0x12c   : > { %v1029_v59 = vmax.f32 %v933_v42, 0.0  ;;  %v936_v60 = vadd.f32 %v1386_v57, %v775_v51  ;;  %v1279_v61 = vpop.f32.mrb[27].mxu0  ;;  %v927_v62 = vpop.f32.mrb[27].mxu1 }
 0x12d   : > { %v1027_v63 = vmax.f32 %v925_v53, 0.0  ;;  %v1280_v0 = vadd.f32 %v1279_v61, %v1278_v54  ;;  %v928_v1 = vadd.f32 %v927_v62, %v767_v58  ;;  %v780_v6 = vadd.f32 %v1277_v52, %v1703_v56 }
 0x12e   : > { %1061 = vst [vmem:[%s1712_s22 + $0x50] sm:$0xff] %v1029_v59  ;;  %v1030_v2 = vmax.f32 %v936_v60, 0.0 }
 0x12f   : > { %1059 = vst [vmem:[%s1712_s22 + $0x40] sm:$0xff] %v1027_v63  ;;  %v1028_v3 = vmax.f32 %v928_v1, 0.0  ;;  %v783_v13 = vadd.f32 %v1280_v0, %v1703_v56  ;;  %v836_v0 = vadd.f32 %v1688_v26, %v1703_v56 }
 0x130   : > { %1062 = vst [vmem:[%s1712_s22 + $0x58] sm:$0xff] %v1030_v2 }
 0x131   : > { %1060 = vst [vmem:[%s1712_s22 + $0x48] sm:$0xff] %v1028_v3  ;;  %v1281_v4 = vpop.f32.mrb[28].mxu0  ;;  %v1389_v5 = vpop.f32.mrb[28].mxu1 }
 0x132   : > { %v1282_v7 = vpop.f32.mrb[29].mxu0  ;;  %v940_v8 = vpop.f32.mrb[29].mxu1 }
 0x133   : > { %v1283_v9 = vadd.f32 %v1282_v7, %v1281_v4  ;;  %v941_v10 = vadd.f32 %v940_v8, %v780_v6  ;;  %v1284_v11 = vpop.f32.mrb[30].mxu0  ;;  %v1390_v12 = vpop.f32.mrb[30].mxu1 }
 0x134   : > { %v1285_v15 = vpop.f32.mrb[31].mxu0  ;;  %v943_v16 = vpop.f32.mrb[31].mxu1 }
 0x135   : > { %v788_v17 = vadd.f32 %v1283_v9, %v1703_v56  ;;  %v1031_v20 = vmax.f32 %v941_v10, 0.0  ;;  %v1286_v21 = vadd.f32 %v1285_v15, %v1284_v11  ;;  %v944_v18 = vadd.f32 %v943_v16, %v783_v13 }
 0x136   : > { %v839_v9 = vadd.f32 %v1690_v31, %v1703_v56  ;;  %v831_v15 = vadd.f32 %v1686_v19, %v1703_v56 }
 0x137   : > { %v949_v22 = vadd.f32 %v1389_v5, %v788_v17  ;;  %1063 = vst [vmem:[%s1712_s22 + $0x60] sm:$0xff] %v1031_v20  ;;  %v791_v23 = vadd.f32 %v1286_v21, %v1703_v56  ;;  %v1032_v24 = vmax.f32 %v944_v18, 0.0  ;;  %v828_v5 = vadd.f32 %v1684_v14, %v1703_v56 }
 0x139   : > { %v1033_v25 = vmax.f32 %v949_v22, 0.0  ;;  %v952_v27 = vadd.f32 %v1390_v12, %v791_v23  ;;  %1064 = vst [vmem:[%s1712_s22 + $0x68] sm:$0xff] %v1032_v24  ;;  %v1287_v28 = vpop.f32.mrb[32].mxu0  ;;  %v1393_v29 = vpop.f32.mrb[32].mxu1 }
 0x13a   : > { %v1288_v30 = vpop.f32.mrb[33].mxu0  ;;  %v956_v32 = vpop.f32.mrb[33].mxu1 }
 0x13b   : > { %1065 = vst [vmem:[%s1712_s22 + $0x70] sm:$0xff] %v1033_v25  ;;  %v1034_v33 = vmax.f32 %v952_v27, 0.0  ;;  %v1289_v34 = vadd.f32 %v1288_v30, %v1287_v28  ;;  %v1290_v35 = vpop.f32.mrb[34].mxu0  ;;  %v1394_v36 = vpop.f32.mrb[34].mxu1  ;;  %v852_v27 = vadd.f32 %v1696_v50, %v1703_v56 }
 0x13c   : > { %v1291_v37 = vpop.f32.mrb[35].mxu0  ;;  %v959_v39 = vpop.f32.mrb[35].mxu1 }
 0x13d   : > { %1066 = vst [vmem:[%s1712_s22 + $0x78] sm:$0xff] %v1034_v33  ;;  %v796_v40 = vadd.f32 %v1289_v34, %v1703_v56  ;;  %v1292_v41 = vadd.f32 %v1291_v37, %v1290_v35  ;;  %v844_v33 = vadd.f32 %v1692_v38, %v1703_v56  ;;  %v855_v37 = vadd.f32 %v1698_v55, %v1703_v56 }
 0x13f   : > { %v957_v44 = vadd.f32 %v956_v32, %v796_v40  ;;  %v799_v45 = vadd.f32 %v1292_v41, %v1703_v56 }
 0x141   : > { %v1035_v46 = vmax.f32 %v957_v44, 0.0  ;;  %v960_v47 = vadd.f32 %v959_v39, %v799_v45  ;;  %v1293_v42 = vpop.f32.mrb[36].mxu0  ;;  %v1745_v48 = vpop.f32.mrb[36].mxu1  ;;  %v847_v45 = vadd.f32 %v1694_v43, %v1703_v56 }
 0x142   : > { %v1294_v49 = vpop.f32.mrb[37].mxu0  ;;  %v972_v51 = vpop.f32.mrb[37].mxu1 }
 0x143   : > { %1067 = vst [vmem:[%s1712_s22 + $0x80] sm:$0xff] %v1035_v46  ;;  %v1036_v52 = vmax.f32 %v960_v47, 0.0  ;;  %v1295_v53 = vadd.f32 %v1294_v49, %v1293_v42  ;;  %v1296_v54 = vpop.f32.mrb[38].mxu0  ;;  %v1748_v57 = vpop.f32.mrb[38].mxu1 }
 0x144   : > { %v1297_v58 = vpop.f32.mrb[39].mxu0  ;;  %v975_v59 = vpop.f32.mrb[39].mxu1 }
 0x145   : > { %1068 = vst [vmem:[%s1712_s22 + $0x88] sm:$0xff] %v1036_v52  ;;  %v804_v60 = vadd.f32 %v1295_v53, %v1703_v56  ;;  %v1298_v61 = vadd.f32 %v1297_v58, %v1296_v54 }
 0x147   : > { %v965_v62 = vadd.f32 %v1393_v29, %v804_v60  ;;  %v807_v63 = vadd.f32 %v1298_v61, %v1703_v56 }
 0x149   : > { %v1037_v1 = vmax.f32 %v965_v62, 0.0  ;;  %v968_v2 = vadd.f32 %v1394_v36, %v807_v63  ;;  %v1299_v3 = vpop.f32.mrb[40].mxu0  ;;  %v1401_v4 = vpop.f32.mrb[40].mxu1 }
 0x14a   : > { %v997_v6 = vadd.f32 %v1401_v4, %v836_v0  ;;  %v1300_v7 = vpop.f32.mrb[41].mxu0  ;;  %v988_v8 = vpop.f32.mrb[41].mxu1 }
 0x14b   : > { %1069 = vst [vmem:[%s1712_s22 + $0x90] sm:$0xff] %v1037_v1  ;;  %v1038_v10 = vmax.f32 %v968_v2, 0.0  ;;  %v1301_v11 = vadd.f32 %v1300_v7, %v1299_v3  ;;  %v989_v12 = vadd.f32 %v988_v8, %v828_v5  ;;  %v1302_v26 = vpop.f32.mrb[42].mxu0  ;;  %v1402_v13 = vpop.f32.mrb[42].mxu1 }
 0x14c   : > { %v1045_v14 = vmax.f32 %v997_v6, 0.0  ;;  %v1000_v16 = vadd.f32 %v1402_v13, %v839_v9  ;;  %v1303_v17 = vpop.f32.mrb[43].mxu0  ;;  %v991_v20 = vpop.f32.mrb[43].mxu1 }
 0x14d   : > { %1070 = vst [vmem:[%s1712_s22 + $0x98] sm:$0xff] %v1038_v10  ;;  %v812_v31 = vadd.f32 %v1301_v11, %v1703_v56  ;;  %v1043_v21 = vmax.f32 %v989_v12, 0.0  ;;  %v1304_v18 = vadd.f32 %v1303_v17, %v1302_v26  ;;  %v992_v22 = vadd.f32 %v991_v20, %v831_v15 }
 0x14e   : > { %1077 = vst [vmem:[%s1712_s22 + $0xd0] sm:$0xff] %v1045_v14  ;;  %v1046_v23 = vmax.f32 %v1000_v16, 0.0 }
 0x14f   : > { %v973_v24 = vadd.f32 %v972_v51, %v812_v31  ;;  %1075 = vst [vmem:[%s1712_s22 + $0xc0] sm:$0xff] %v1043_v21  ;;  %v815_v25 = vadd.f32 %v1304_v18, %v1703_v56  ;;  %v1044_v19 = vmax.f32 %v992_v22, 0.0 }
 0x150   : > { %1078 = vst [vmem:[%s1712_s22 + $0xd8] sm:$0xff] %v1046_v23 }
 0x151   : > { %v1039_v28 = vmax.f32 %v973_v24, 0.0  ;;  %v976_v29 = vadd.f32 %v975_v59, %v815_v25  ;;  %1076 = vst [vmem:[%s1712_s22 + $0xc8] sm:$0xff] %v1044_v19  ;;  %v1305_v30 = vpop.f32.mrb[44].mxu0  ;;  %v1405_v32 = vpop.f32.mrb[44].mxu1 }
 0x152   : > { %v1013_v34 = vadd.f32 %v1405_v32, %v852_v27  ;;  %v1306_v35 = vpop.f32.mrb[45].mxu0  ;;  %v1004_v36 = vpop.f32.mrb[45].mxu1 }
 0x153   : > { %1071 = vst [vmem:[%s1712_s22 + $0xa0] sm:$0xff] %v1039_v28  ;;  %v1040_v39 = vmax.f32 %v976_v29, 0.0  ;;  %v1307_v40 = vadd.f32 %v1306_v35, %v1305_v30  ;;  %v1005_v50 = vadd.f32 %v1004_v36, %v844_v33  ;;  %v1308_v41 = vpop.f32.mrb[46].mxu0  ;;  %v1406_v44 = vpop.f32.mrb[46].mxu1 }
 0x154   : > { %v1049_v38 = vmax.f32 %v1013_v34, 0.0  ;;  %v1016_v46 = vadd.f32 %v1406_v44, %v855_v37  ;;  %v1309_v47 = vpop.f32.mrb[47].mxu0  ;;  %v1007_v42 = vpop.f32.mrb[47].mxu1 }
 0x155   : > { %1072 = vst [vmem:[%s1712_s22 + $0xa8] sm:$0xff] %v1040_v39  ;;  %v820_v55 = vadd.f32 %v1307_v40, %v1703_v56  ;;  %v1047_v49 = vmax.f32 %v1005_v50, 0.0  ;;  %v1310_v51 = vadd.f32 %v1309_v47, %v1308_v41  ;;  %v1008_v52 = vadd.f32 %v1007_v42, %v847_v45 }
 0x156   : > { %1081 = vst [vmem:[%s1712_s22 + $0xf0] sm:$0xff] %v1049_v38  ;;  %v1050_v53 = vmax.f32 %v1016_v46, 0.0 }
 0x157   : > { %v981_v54 = vadd.f32 %v1745_v48, %v820_v55  ;;  %1079 = vst [vmem:[%s1712_s22 + $0xe0] sm:$0xff] %v1047_v49  ;;  %v823_v43 = vadd.f32 %v1310_v51, %v1703_v56  ;;  %v1048_v58 = vmax.f32 %v1008_v52, 0.0 }
 0x158   : > { %1082 = vst [vmem:[%s1712_s22 + $0xf8] sm:$0xff] %v1050_v53 }
 0x159   : > { %v1041_v59 = vmax.f32 %v981_v54, 0.0  ;;  %v984_v60 = vadd.f32 %v1748_v57, %v823_v43  ;;  %1080 = vst [vmem:[%s1712_s22 + $0xe8] sm:$0xff] %v1048_v58 }
 0x15b   : > { %1073 = vst [vmem:[%s1712_s22 + $0xb0] sm:$0xff] %v1041_v59  ;;  %v1042_v61 = vmax.f32 %v984_v60, 0.0 }
 0x15d   : > { %1074 = vst [vmem:[%s1712_s22 + $0xb8] sm:$0xff] %v1042_v61 }
 0x15e PF: > { %s13_s12 = sadd.s32 1, %s1526_s12  }
 0x15f   : > { %p10_p4 = scmp.ge.s32.totalorder %s13_s12, 4  }
 0x161   :  { %12 = sbr.rel (!%p10_p4) target bundleno = 1 (0x1), region = 62 }

// kernel: alex_bottom_forward.9
= control target key start
LH: loop header
LB: loop body
LE: loop exit
PB: predicated region body
PF: predicated region fallthrough
CT: control target
= control target key end

     0   :  { %s561_s15 = smov 0   ;;  %s680_s0 = inlined_call_operand.vmem [shape: f32[2,8,8,16], index: 0, kind: input, shape index: {}]   ;;  %s681_s1 = inlined_call_operand.vmem [shape: f32[2,8,8,16], index: 1, kind: input, shape index: {}]   ;;  %s682_s2 = inlined_call_operand.vmem [shape: f32[2,8,8,16], index: 2, kind: input, shape index: {}]   ;;  %s683_s3 = inlined_call_operand.vmem [shape: f32[2,8,8,16], index: 3, kind: input, shape index: {}]   ;;  %s684_s4 = inlined_call_operand.vmem [shape: f32[2,7,7,16], index: 4, kind: output, shape index: {}]  }
   0x1 LB: > { %s478_s16 = sadd.s32 4294967295, %s534_s15   ;;  %p482_p0 = scmp.ge.s32.totalorder %s534_s15, 1  ;;  %s534_s15 = sphi %s561_s15, %s14_s15  }
   0x2   : > { %p192_p1 = scmp.lt.s32.totalorder %s534_s15, 3 }
   0x4   : > { %p193_p2 = pnand %p482_p0, %p192_p1 }
   0x5   : > { %p233_p3 = scmp.lt.s32.totalorder (!%p193_p2), %s478_s16, 1  ;;  %vm379_vm0 = vcmask (!%p193_p2), 129024  }
   0x6   : > { %196 = sbr.rel (%p193_p2) target bundleno = 50 (0x32), region = 36 }
   0xd   : > { %s686_s16 = smov (!%p233_p3, %s478_s16), 1 }
   0xe   : > { %s515_s17 = sshll.u32 %s686_s16, 6  ;;  %s519_s30 = smul.u32 56, %s686_s16 }
   0xf   : > { %s575_s20 = scalar_lea.vmem %s680_s0, %s515_s17  ;;  %s583_s23 = scalar_lea.vmem %s681_s1, %s515_s17 }
  0x10   : > { %v258_v0 = vld [vmem:[%s575_s20] sm:$0x7f]  ;;  %v492_v2 = vld [vmem:[%s575_s20 + $0x8] sm:$0x7f]  ;;  %v493_v8 = vld [vmem:[%s575_s20 + $0x10] sm:$0x7f]  ;;  %s593_s26 = scalar_lea.vmem %s682_s2, %s515_s17  ;;  %s603_s29 = scalar_lea.vmem %s683_s3, %s515_s17 }
  0x11   : > { %v265_v1 = vld [vmem:[%s575_s20 + $0x1] sm:$0x7f]  ;;  %v499_v4 = vld [vmem:[%s575_s20 + $0x9] sm:$0x7f]  ;;  %v500_v13 = vld [vmem:[%s575_s20 + $0x11] sm:$0x7f]  ;;  %s630_s7 = scalar_lea.vmem %s684_s4, %s519_s30 }
  0x12   : > { %v272_v3 = vmax.f32 %v258_v0, %v265_v1  ;;  %v259_v6 = vld [vmem:[%s575_s20 + $0x8] sm:$0x7f]  ;;  %v308_v9 = vld [vmem:[%s583_s23] sm:$0x7f]  ;;  %v260_v15 = vld [vmem:[%s575_s20 + $0x10] sm:$0x7f] }
  0x13   : > { %v266_v7 = vld [vmem:[%s575_s20 + $0x9] sm:$0x7f]  ;;  %v267_v16 = vld [vmem:[%s575_s20 + $0x11] sm:$0x7f]  ;;  %v494_v17 = vld [vmem:[%s575_s20 + $0x18] sm:$0x7f] }
  0x14   : > { %v287_v5 = vmax.f32 %v272_v3, %v492_v2  ;;  %v273_v10 = vmax.f32 %v259_v6, %v266_v7  ;;  %v506_v12 = vld [vmem:[%s583_s23 + $0x8] sm:$0x7f]  ;;  %v274_v20 = vmax.f32 %v260_v15, %v267_v16  ;;  %v337_v21 = vld [vmem:[%s593_s26] sm:$0x7f]  ;;  %v507_v23 = vld [vmem:[%s583_s23 + $0x10] sm:$0x7f] }
  0x15   : > { %v309_v19 = vld [vmem:[%s583_s23 + $0x8] sm:$0x7f]  ;;  %v501_v24 = vld [vmem:[%s575_s20 + $0x19] sm:$0x7f]  ;;  %v495_v29 = vld [vmem:[%s575_s20 + $0x20] sm:$0x7f] }
  0x16   : > { %v301_v11 = vmax.f32 %v287_v5, %v499_v4  ;;  %v288_v14 = vmax.f32 %v273_v10, %v493_v8  ;;  %v289_v26 = vmax.f32 %v274_v20, %v494_v17  ;;  %v261_v27 = vld [vmem:[%s575_s20 + $0x18] sm:$0x7f]  ;;  %v351_v30 = vld [vmem:[%s593_s26 + $0x1] sm:$0x7f]  ;;  %v310_v33 = vld [vmem:[%s583_s23 + $0x10] sm:$0x7f] }
  0x17   : > { %v268_v28 = vld [vmem:[%s575_s20 + $0x19] sm:$0x7f]  ;;  %v365_v31 = vld [vmem:[%s603_s29] sm:$0x7f]  ;;  %v338_v36 = vld [vmem:[%s593_s26 + $0x8] sm:$0x7f] }
  0x18   : > { %v315_v18 = vmax.f32 %v301_v11, %v308_v9  ;;  %v302_v22 = vmax.f32 %v288_v14, %v500_v13  ;;  %v275_v34 = vmax.f32 %v261_v27, %v268_v28  ;;  %v303_v37 = vmax.f32 %v289_v26, %v501_v24  ;;  %v508_v38 = vld [vmem:[%s583_s23 + $0x18] sm:$0x7f]  ;;  %v502_v39 = vld [vmem:[%s575_s20 + $0x21] sm:$0x7f]  ;;  %v496_v44 = vld [vmem:[%s575_s20 + $0x28] sm:$0x7f] }
  0x19   : > { %v262_v42 = vld [vmem:[%s575_s20 + $0x20] sm:$0x7f]  ;;  %v352_v46 = vld [vmem:[%s593_s26 + $0x9] sm:$0x7f]  ;;  %v311_v49 = vld [vmem:[%s583_s23 + $0x18] sm:$0x7f] }
  0x1a   : > { %v330_v25 = vmax.f32 %v315_v18, %v506_v12  ;;  %v316_v32 = vmax.f32 %v302_v22, %v309_v19  ;;  %v290_v41 = vmax.f32 %v275_v34, %v495_v29  ;;  %v269_v43 = vld [vmem:[%s575_s20 + $0x21] sm:$0x7f]  ;;  %v366_v47 = vld [vmem:[%s603_s29 + $0x8] sm:$0x7f]  ;;  %v317_v48 = vmax.f32 %v303_v37, %v310_v33  ;;  %v339_v52 = vld [vmem:[%s593_s26 + $0x10] sm:$0x7f] }
  0x1b   : > { %v276_v50 = vmax.f32 %v262_v42, %v269_v43  ;;  %v509_v54 = vld [vmem:[%s583_s23 + $0x20] sm:$0x7f]  ;;  %v503_v55 = vld [vmem:[%s575_s20 + $0x29] sm:$0x7f]  ;;  %v497_v61 = vld [vmem:[%s575_s20 + $0x30] sm:$0x7f] }
  0x1c   : > { %v344_v35 = vmax.f32 %v330_v25, %v337_v21  ;;  %v331_v40 = vmax.f32 %v316_v32, %v507_v23  ;;  %v304_v53 = vmax.f32 %v290_v41, %v502_v39  ;;  %v332_v57 = vmax.f32 %v317_v48, %v508_v38  ;;  %v263_v59 = vld [vmem:[%s575_s20 + $0x28] sm:$0x7f]  ;;  %v353_v63 = vld [vmem:[%s593_s26 + $0x11] sm:$0x7f]  ;;  %v312_v2 = vld [vmem:[%s583_s23 + $0x20] sm:$0x7f] }
  0x1d   : > { %v291_v58 = vmax.f32 %v276_v50, %v496_v44  ;;  %v270_v60 = vld [vmem:[%s575_s20 + $0x29] sm:$0x7f]  ;;  %v367_v0 = vld [vmem:[%s603_s29 + $0x10] sm:$0x7f]  ;;  %v340_v5 = vld [vmem:[%s593_s26 + $0x18] sm:$0x7f] }
  0x1e   : > { %v358_v45 = vmax.f32 %v344_v35, %v351_v30  ;;  %v345_v51 = vmax.f32 %v331_v40, %v338_v36  ;;  %v318_v1 = vmax.f32 %v304_v53, %v311_v49  ;;  %v277_v3 = vmax.f32 %v263_v59, %v270_v60  ;;  %v510_v7 = vld [vmem:[%s583_s23 + $0x28] sm:$0x7f]  ;;  %v504_v8 = vld [vmem:[%s575_s20 + $0x31] sm:$0x7f]  ;;  %v498_v14 = vld [vmem:[%s575_s20 + $0x38] sm:$0x7f] }
  0x1f   : > { %v346_v4 = vmax.f32 %v332_v57, %v339_v52  ;;  %v305_v6 = vmax.f32 %v291_v58, %v503_v55  ;;  %v264_v12 = vld [vmem:[%s575_s20 + $0x30] sm:$0x7f]  ;;  %v354_v16 = vld [vmem:[%s593_s26 + $0x19] sm:$0x7f]  ;;  %v313_v18 = vld [vmem:[%s583_s23 + $0x28] sm:$0x7f] }
  0x20   : > { %v372_v56 = vmax.f32 %v358_v45, %v365_v31  ;;  %v359_v62 = vmax.f32 %v345_v51, %v352_v46  ;;  %v333_v10 = vmax.f32 %v318_v1, %v509_v54  ;;  %v292_v11 = vmax.f32 %v277_v3, %v497_v61  ;;  %v271_v13 = vld [vmem:[%s575_s20 + $0x31] sm:$0x7f]  ;;  %v341_v21 = vld [vmem:[%s593_s26 + $0x20] sm:$0x7f]  ;;  %v505_v23 = vld [vmem:[%s575_s20 + $0x39] sm:$0x7f] }
  0x21   : > { %v360_v15 = vmax.f32 %v346_v4, %v353_v63  ;;  %v319_v17 = vmax.f32 %v305_v6, %v312_v2  ;;  %v278_v19 = vmax.f32 %v264_v12, %v271_v13  ;;  %v368_v25 = vld [vmem:[%s603_s29 + $0x18] sm:$0x7f]  ;;  %v511_v27 = vld [vmem:[%s583_s23 + $0x30] sm:$0x7f]  ;;  %v355_v30 = vld [vmem:[%s593_s26 + $0x21] sm:$0x7f] }
  0x22   : > { %380 = vst.msk [vmem:[%s630_s7] sm:$0x7f] %vm379_vm0, %v372_v56  ;;  %v373_v9 = vmax.f32 %v359_v62, %v366_v47  ;;  %v347_v20 = vmax.f32 %v333_v10, %v340_v5  ;;  %v306_v22 = vmax.f32 %v292_v11, %v504_v8  ;;  %v314_v32 = vld [vmem:[%s583_s23 + $0x30] sm:$0x7f]  ;;  %v342_v34 = vld [vmem:[%s593_s26 + $0x28] sm:$0x7f] }
  0x23   : > { %v374_v24 = vmax.f32 %v360_v15, %v367_v0  ;;  %v334_v26 = vmax.f32 %v319_v17, %v510_v7  ;;  %v293_v28 = vmax.f32 %v278_v19, %v498_v14  ;;  %v369_v37 = vld [vmem:[%s603_s29 + $0x20] sm:$0x7f]  ;;  %v512_v39 = vld [vmem:[%s583_s23 + $0x38] sm:$0x7f]  ;;  %v356_v41 = vld [vmem:[%s593_s26 + $0x29] sm:$0x7f] }
  0x24   : > { %381 = vst.msk [vmem:[%s630_s7 + $0x8] sm:$0x7f] %vm379_vm0, %v373_v9  ;;  %v361_v29 = vmax.f32 %v347_v20, %v354_v16  ;;  %v320_v31 = vmax.f32 %v306_v22, %v313_v18  ;;  %v343_v44 = vld [vmem:[%s593_s26 + $0x30] sm:$0x7f]  ;;  %v370_v46 = vld [vmem:[%s603_s29 + $0x28] sm:$0x7f] }
  0x25   : > { %382 = vst.msk [vmem:[%s630_s7 + $0x10] sm:$0x7f] %vm379_vm0, %v374_v24  ;;  %v348_v33 = vmax.f32 %v334_v26, %v341_v21  ;;  %v307_v35 = vmax.f32 %v293_v28, %v505_v23  ;;  %v357_v49 = vld [vmem:[%s593_s26 + $0x31] sm:$0x7f] }
  0x26   : > { %v375_v36 = vmax.f32 %v361_v29, %v368_v25  ;;  %v335_v38 = vmax.f32 %v320_v31, %v511_v27  ;;  %v371_v52 = vld [vmem:[%s603_s29 + $0x30] sm:$0x7f] }
  0x27   : > { %v362_v40 = vmax.f32 %v348_v33, %v355_v30  ;;  %v321_v42 = vmax.f32 %v307_v35, %v314_v32 }
  0x28   : > { %383 = vst.msk [vmem:[%s630_s7 + $0x18] sm:$0x7f] %vm379_vm0, %v375_v36  ;;  %v349_v43 = vmax.f32 %v335_v38, %v342_v34 }
  0x29   : > { %v376_v45 = vmax.f32 %v362_v40, %v369_v37  ;;  %v336_v47 = vmax.f32 %v321_v42, %v512_v39 }
  0x2a   : > { %v363_v48 = vmax.f32 %v349_v43, %v356_v41 }
  0x2b   : > { %384 = vst.msk [vmem:[%s630_s7 + $0x20] sm:$0x7f] %vm379_vm0, %v376_v45  ;;  %v350_v50 = vmax.f32 %v336_v47, %v343_v44 }
  0x2c   : > { %v377_v51 = vmax.f32 %v363_v48, %v370_v46 }
  0x2d   : > { %v364_v53 = vmax.f32 %v350_v50, %v357_v49 }
  0x2e   : > { %385 = vst.msk [vmem:[%s630_s7 + $0x28] sm:$0x7f] %vm379_vm0, %v377_v51 }
  0x2f   : > { %v378_v54 = vmax.f32 %v364_v53, %v371_v52 }
  0x31   : > { %386 = vst.msk [vmem:[%s630_s7 + $0x30] sm:$0x7f] %vm379_vm0, %v378_v54 }
  0x32 PF: > { %s14_s15 = sadd.s32 1, %s534_s15  }
  0x33   : > { %p11_p4 = scmp.ge.s32.totalorder %s14_s15, 4  }
  0x35   :  { %13 = sbr.rel (!%p11_p4) target bundleno = 1 (0x1), region = 77 }

// kernel: alex_bottom_forward.10
= control target key start
LH: loop header
LB: loop body
LE: loop exit
PB: predicated region body
PF: predicated region fallthrough
CT: control target
= control target key end

     0   :  { %s1144_s1 = inlined_call_operand.vmem [shape: bf16[512,128], index: 1, kind: input, shape index: {}]   ;;  %s1145_s0 = inlined_call_operand.vmem [shape: bf16[104,512], index: 0, kind: input, shape index: {}]   ;;  %s1146_s2 = inlined_call_operand.vmem [shape: f32[1,128], index: 2, kind: input, shape index: {}]   ;;  %s1147_s3 = inlined_call_operand.vmem [shape: f32[104,128], index: 3, kind: output, shape index: {}]  }
   0x1   :  { %v821_v0 = vld [vmem:[%s1144_s1 + $0x40] sm:$0xff]   ;;  %v825_v4 = vld [vmem:[%s1144_s1 + $0x48] sm:$0xff]   ;;  %v829_v8 = vld [vmem:[%s1144_s1 + $0x50] sm:$0xff]  }
   0x2   :  { %v822_v1 = vld [vmem:[%s1144_s1 + $0xc0] sm:$0xff]   ;;  %705 = vmatprep.subr.bf16.mxu0 %v821_v0  ;;  %v826_v5 = vld [vmem:[%s1144_s1 + $0xc8] sm:$0xff]   ;;  %v830_v9 = vld [vmem:[%s1144_s1 + $0xd0] sm:$0xff]  }
   0x3   :  { %v823_v2 = vld [vmem:[%s1144_s1] sm:$0xff]   ;;  %763 = vmatprep.subr.bf16.mxu1 %v822_v1  ;;  %v827_v6 = vld [vmem:[%s1144_s1 + $0x8] sm:$0xff]   ;;  %v831_v10 = vld [vmem:[%s1144_s1 + $0x10] sm:$0xff]  }
   0x4   :  { %v824_v3 = vld [vmem:[%s1144_s1 + $0x80] sm:$0xff]   ;;  %706 = vmatpush3.bf16.msra.mxu0 %v823_v2  ;;  %v828_v7 = vld [vmem:[%s1144_s1 + $0x88] sm:$0xff]   ;;  %v832_v11 = vld [vmem:[%s1144_s1 + $0x90] sm:$0xff]  }
   0x5   :  { %764 = vmatpush3.bf16.msra.mxu1 %v824_v3  ;;  %707 = vmatprep.subr.bf16.mxu0 %v825_v4  ;;  %v833_v12 = vld [vmem:[%s1144_s1 + $0x58] sm:$0xff]   ;;  %v837_v16 = vld [vmem:[%s1144_s1 + $0x60] sm:$0xff]   ;;  %v841_v20 = vld [vmem:[%s1144_s1 + $0x68] sm:$0xff]  }
   0x6   :  { %765 = vmatprep.subr.bf16.mxu1 %v826_v5  ;;  %v834_v13 = vld [vmem:[%s1144_s1 + $0xd8] sm:$0xff]   ;;  %v838_v17 = vld [vmem:[%s1144_s1 + $0xe0] sm:$0xff]   ;;  %v842_v21 = vld [vmem:[%s1144_s1 + $0xe8] sm:$0xff]  }
   0x7   :  { %v835_v14 = vld [vmem:[%s1144_s1 + $0x18] sm:$0xff]   ;;  %v839_v18 = vld [vmem:[%s1144_s1 + $0x20] sm:$0xff]   ;;  %v843_v22 = vld [vmem:[%s1144_s1 + $0x28] sm:$0xff]  }
   0x8   :  { %708 = vmatpush3.bf16.msra.mxu0 %v827_v6  ;;  %v836_v15 = vld [vmem:[%s1144_s1 + $0x98] sm:$0xff]   ;;  %v840_v19 = vld [vmem:[%s1144_s1 + $0xa0] sm:$0xff]   ;;  %v844_v23 = vld [vmem:[%s1144_s1 + $0xa8] sm:$0xff]  }
   0x9   :  { %766 = vmatpush3.bf16.msra.mxu1 %v828_v7  ;;  %709 = vmatprep.subr.bf16.mxu0 %v829_v8  ;;  %v845_v24 = vld [vmem:[%s1144_s1 + $0x70] sm:$0xff]   ;;  %v849_v28 = vld [vmem:[%s1144_s1 + $0x78] sm:$0xff]   ;;  %v39_v54 = vld [vmem:[%s1145_s0 + $0xc0] sm:$0xff] }
   0xa   :  { %767 = vmatprep.subr.bf16.mxu1 %v830_v9  ;;  %v846_v25 = vld [vmem:[%s1144_s1 + $0xf0] sm:$0xff]   ;;  %v850_v29 = vld [vmem:[%s1144_s1 + $0xf8] sm:$0xff]   ;;  %v40_v55 = vld [vmem:[%s1145_s0 + $0xc8] sm:$0xff]  ;;  %v670_v58 = vcombine.high %v39_v54, %v39_v54  ;;  %v669_v60 = vcombine.low %v39_v54, %v39_v54 }
   0xb   :  { %v847_v26 = vld [vmem:[%s1144_s1 + $0x30] sm:$0xff]   ;;  %v851_v30 = vld [vmem:[%s1144_s1 + $0x38] sm:$0xff]   ;;  %v672_v59 = vcombine.high %v40_v55, %v40_v55  ;;  %v671_v61 = vcombine.low %v40_v55, %v40_v55  ;;  %v1090_v0 = vld [vmem:[%s1146_s2] ss:$0 sm:$0xff] }
   0xc   :  { %710 = vmatpush3.bf16.msra.mxu0 %v831_v10  ;;  %v848_v27 = vld [vmem:[%s1144_s1 + $0xb0] sm:$0xff]   ;;  %v852_v31 = vld [vmem:[%s1144_s1 + $0xb8] sm:$0xff]  }
   0xd   :  { %768 = vmatpush3.bf16.msra.mxu1 %v832_v11  ;;  %711 = vmatprep.subr.bf16.mxu0 %v833_v12  ;;  %v853_v32 = vld [vmem:[%s1145_s0] ss:$16 sps:$4 sm:$0xff]   ;;  %v855_v33 = vld [vmem:[%s1145_s0 + $0x4] ss:$16 sps:$4 sm:$0xff]   ;;  %v856_v34 = vld [vmem:[%s1145_s0 + $0x8] ss:$16 sps:$4 sm:$0xff]  }
   0xe   :  { %769 = vmatprep.subr.bf16.mxu1 %v834_v13  ;;  %v858_v35 = vld [vmem:[%s1145_s0 + $0xc] ss:$16 sps:$4 sm:$0xff]   ;;  %470 = vmatprep.mubr.bf16.mxu0 %v855_v33  ;;  %v859_v36 = vld [vmem:[%s1145_s0 + $0x24] ss:$16 sps:$4 sm:$0xff]   ;;  %v863_v38 = vld [vmem:[%s1145_s0 + $0x20] ss:$16 sps:$4 sm:$0xff]  }
   0xf   :  { %558 = vmatprep.mubr.bf16.mxu1 %v858_v35  ;;  %v861_v37 = vld [vmem:[%s1145_s0 + $0x2c] ss:$16 sps:$4 sm:$0xff]   ;;  %v864_v39 = vld [vmem:[%s1145_s0 + $0x28] ss:$16 sps:$4 sm:$0xff]   ;;  %v865_v40 = vld [vmem:[%s1145_s0 + $0x44] ss:$16 sps:$4 sm:$0xff]  }
  0x10   :  { %712 = vmatpush3.bf16.msra.mxu0 %v835_v14  ;;  %v867_v41 = vld [vmem:[%s1145_s0 + $0x4c] ss:$16 sps:$4 sm:$0xff]   ;;  %v869_v42 = vld [vmem:[%s1145_s0 + $0x40] ss:$16 sps:$4 sm:$0xff]   ;;  %v870_v43 = vld [vmem:[%s1145_s0 + $0x48] ss:$16 sps:$4 sm:$0xff]  }
  0x11   :  { %770 = vmatpush3.bf16.msra.mxu1 %v836_v15  ;;  %713 = vmatprep.subr.bf16.mxu0 %v837_v16  ;;  %v871_v44 = vld [vmem:[%s1145_s0 + $0x64] ss:$16 sps:$4 sm:$0xff]   ;;  %v873_v45 = vld [vmem:[%s1145_s0 + $0x6c] ss:$16 sps:$4 sm:$0xff]   ;;  %v875_v46 = vld [vmem:[%s1145_s0 + $0x60] ss:$16 sps:$4 sm:$0xff]  }
  0x12   :  { %771 = vmatprep.subr.bf16.mxu1 %v838_v17  ;;  %v876_v47 = vld [vmem:[%s1145_s0 + $0x68] ss:$16 sps:$4 sm:$0xff]   ;;  %v877_v48 = vld [vmem:[%s1145_s0 + $0x84] ss:$16 sps:$4 sm:$0xff]   ;;  %v879_v49 = vld [vmem:[%s1145_s0 + $0x8c] ss:$16 sps:$4 sm:$0xff]  }
  0x13   :  { %v881_v50 = vld [vmem:[%s1145_s0 + $0x80] ss:$16 sps:$4 sm:$0xff]   ;;  %v882_v51 = vld [vmem:[%s1145_s0 + $0x88] ss:$16 sps:$4 sm:$0xff]   ;;  %v883_v52 = vld [vmem:[%s1145_s0 + $0xa4] ss:$16 sps:$4 sm:$0xff]  }
  0x14   :  { %714 = vmatpush3.bf16.msra.mxu0 %v839_v18  ;;  %v885_v53 = vld [vmem:[%s1145_s0 + $0xac] ss:$16 sps:$4 sm:$0xff]   ;;  %v887_v56 = vld [vmem:[%s1145_s0 + $0xa0] ss:$16 sps:$4 sm:$0xff]   ;;  %v888_v57 = vld [vmem:[%s1145_s0 + $0xa8] ss:$16 sps:$4 sm:$0xff]  }
  0x15   :  { %772 = vmatpush3.bf16.msra.mxu1 %v840_v19  ;;  %715 = vmatprep.subr.bf16.mxu0 %v841_v20 }
  0x16   :  { %773 = vmatprep.subr.bf16.mxu1 %v842_v21 }
  0x18   :  { %716 = vmatpush3.bf16.msra.mxu0 %v843_v22 }
  0x19   :  { %774 = vmatpush3.bf16.msra.mxu1 %v844_v23  ;;  %717 = vmatprep.subr.bf16.mxu0 %v845_v24 }
  0x1a   :  { %775 = vmatprep.subr.bf16.mxu1 %v846_v25 }
  0x1c   :  { %718 = vmatpush3.bf16.msra.mxu0 %v847_v26 }
  0x1d   :  { %776 = vmatpush3.bf16.msra.mxu1 %v848_v27  ;;  %719 = vmatprep.subr.bf16.mxu0 %v849_v28 }
  0x1e   :  { %777 = vmatprep.subr.bf16.mxu1 %v850_v29 }
  0x20   :  { %720 = vmatpush3.bf16.msra.mxu0 %v851_v30 }
  0x21   :  { %778 = vmatpush3.bf16.msra.mxu1 %v852_v31 }
  0x23   :  { %471 = vmatmul.mubr.bf16.vlgmr.msra.gmra.mrb[0].mxu0 %v853_v32 }
  0x24   :  { %559 = vmatmul.mubr.bf16.vlgmr.msra.gmra.mrb[0].mxu1 %v856_v34  ;;  %478 = vmatprep.mubr.bf16.mxu0 %v859_v36 }
  0x25   :  { %566 = vmatprep.mubr.bf16.mxu1 %v861_v37 }
  0x2b   :  { %479 = vmatmul.mubr.bf16.gmra.mrb[4].mxu0 %v863_v38 }
  0x2c   :  { %567 = vmatmul.mubr.bf16.gmra.mrb[4].mxu1 %v864_v39  ;;  %486 = vmatprep.mubr.bf16.mxu0 %v865_v40 }
  0x2d   :  { %574 = vmatprep.mubr.bf16.mxu1 %v867_v41 }
  0x33   :  { %487 = vmatmul.mubr.bf16.gmra.mrb[8].mxu0 %v869_v42 }
  0x34   :  { %575 = vmatmul.mubr.bf16.gmra.mrb[8].mxu1 %v870_v43  ;;  %494 = vmatprep.mubr.bf16.mxu0 %v871_v44 }
  0x35   :  { %582 = vmatprep.mubr.bf16.mxu1 %v873_v45 }
  0x3b   :  { %495 = vmatmul.mubr.bf16.gmra.mrb[12].mxu0 %v875_v46 }
  0x3c   :  { %583 = vmatmul.mubr.bf16.gmra.mrb[12].mxu1 %v876_v47  ;;  %502 = vmatprep.mubr.bf16.mxu0 %v877_v48 }
  0x3d   :  { %590 = vmatprep.mubr.bf16.mxu1 %v879_v49 }
  0x43   :  { %503 = vmatmul.mubr.bf16.gmra.mrb[16].mxu0 %v881_v50 }
  0x44   :  { %591 = vmatmul.mubr.bf16.gmra.mrb[16].mxu1 %v882_v51  ;;  %510 = vmatprep.mubr.bf16.mxu0 %v883_v52 }
  0x45   :  { %598 = vmatprep.mubr.bf16.mxu1 %v885_v53 }
  0x4b   :  { %511 = vmatmul.mubr.bf16.gmra.mrb[20].mxu0 %v887_v56 }
  0x4c   :  { %599 = vmatmul.mubr.bf16.gmra.mrb[20].mxu1 %v888_v57  ;;  %518 = vmatprep.mubr.bf16.mxu0 %v670_v58 }
  0x4d   :  { %606 = vmatprep.mubr.bf16.mxu1 %v672_v59 }
  0x53   :  { %519 = vmatmul.mubr.bf16.gmra.mrb[24].mxu0 %v669_v60 }
  0x54   :  { %607 = vmatmul.mubr.bf16.gmra.mrb[24].mxu1 %v671_v61 }
  0xf6   :  { %v721_v62 = vpop.f32.mrb[0].mxu0 }
  0xf7   :  { %v779_v63 = vpop.f32.mrb[0].mxu1  ;;  %v722_v1 = vpop.f32.mrb[1].mxu0 }
  0xf8   :  { %v723_v2 = vadd.f32 %v722_v1, %v721_v62  ;;  %v780_v3 = vpop.f32.mrb[1].mxu1  ;;  %v724_v4 = vpop.f32.mrb[2].mxu0 }
  0xf9   :  { %v781_v5 = vadd.f32 %v780_v3, %v779_v63  ;;  %v782_v6 = vpop.f32.mrb[2].mxu1  ;;  %v725_v7 = vpop.f32.mrb[3].mxu0 }
  0xfa   :  { %v473_v8 = vadd.f32 %v723_v2, %v1090_v0  ;;  %v726_v9 = vadd.f32 %v725_v7, %v724_v4  ;;  %v783_v10 = vpop.f32.mrb[3].mxu1 }
  0xfb   :  { %v784_v11 = vadd.f32 %v783_v10, %v782_v6 }
  0xfc   :  { %v561_v12 = vadd.f32 %v781_v5, %v473_v8  ;;  %v476_v13 = vadd.f32 %v726_v9, %v1090_v0 }
  0xfe   :  { %v614_v14 = vmax.f32 %v561_v12, 0.0  ;;  %v564_v15 = vadd.f32 %v784_v11, %v476_v13  ;;  %v727_v16 = vpop.f32.mrb[4].mxu0 }
  0xff   :  { %v785_v17 = vpop.f32.mrb[4].mxu1  ;;  %v728_v18 = vpop.f32.mrb[5].mxu0 }
 0x100   :  { %627 = vst [vmem:[%s1147_s3] sm:$0xff] %v614_v14  ;;  %v615_v19 = vmax.f32 %v564_v15, 0.0  ;;  %v729_v20 = vadd.f32 %v728_v18, %v727_v16  ;;  %v786_v21 = vpop.f32.mrb[5].mxu1  ;;  %v730_v22 = vpop.f32.mrb[6].mxu0 }
 0x101   :  { %v787_v23 = vadd.f32 %v786_v21, %v785_v17  ;;  %v788_v24 = vpop.f32.mrb[6].mxu1  ;;  %v731_v25 = vpop.f32.mrb[7].mxu0 }
 0x102   :  { %628 = vst [vmem:[%s1147_s3 + $0x8] sm:$0xff] %v615_v19  ;;  %v481_v26 = vadd.f32 %v729_v20, %v1090_v0  ;;  %v732_v27 = vadd.f32 %v731_v25, %v730_v22  ;;  %v789_v28 = vpop.f32.mrb[7].mxu1 }
 0x103   :  { %v790_v29 = vadd.f32 %v789_v28, %v788_v24 }
 0x104   :  { %v569_v30 = vadd.f32 %v787_v23, %v481_v26  ;;  %v484_v31 = vadd.f32 %v732_v27, %v1090_v0 }
 0x106   :  { %v616_v32 = vmax.f32 %v569_v30, 0.0  ;;  %v572_v33 = vadd.f32 %v790_v29, %v484_v31  ;;  %v733_v34 = vpop.f32.mrb[8].mxu0 }
 0x107   :  { %v791_v35 = vpop.f32.mrb[8].mxu1  ;;  %v734_v36 = vpop.f32.mrb[9].mxu0 }
 0x108   :  { %629 = vst [vmem:[%s1147_s3 + $0x10] sm:$0xff] %v616_v32  ;;  %v617_v37 = vmax.f32 %v572_v33, 0.0  ;;  %v735_v38 = vadd.f32 %v734_v36, %v733_v34  ;;  %v792_v39 = vpop.f32.mrb[9].mxu1  ;;  %v736_v40 = vpop.f32.mrb[10].mxu0 }
 0x109   :  { %v793_v41 = vadd.f32 %v792_v39, %v791_v35  ;;  %v794_v42 = vpop.f32.mrb[10].mxu1  ;;  %v737_v43 = vpop.f32.mrb[11].mxu0 }
 0x10a   :  { %630 = vst [vmem:[%s1147_s3 + $0x18] sm:$0xff] %v617_v37  ;;  %v489_v44 = vadd.f32 %v735_v38, %v1090_v0  ;;  %v738_v45 = vadd.f32 %v737_v43, %v736_v40  ;;  %v795_v46 = vpop.f32.mrb[11].mxu1 }
 0x10b   :  { %v796_v47 = vadd.f32 %v795_v46, %v794_v42 }
 0x10c   :  { %v577_v48 = vadd.f32 %v793_v41, %v489_v44  ;;  %v492_v49 = vadd.f32 %v738_v45, %v1090_v0 }
 0x10e   :  { %v618_v50 = vmax.f32 %v577_v48, 0.0  ;;  %v580_v51 = vadd.f32 %v796_v47, %v492_v49  ;;  %v739_v52 = vpop.f32.mrb[12].mxu0 }
 0x10f   :  { %v797_v53 = vpop.f32.mrb[12].mxu1  ;;  %v740_v54 = vpop.f32.mrb[13].mxu0 }
 0x110   :  { %631 = vst [vmem:[%s1147_s3 + $0x20] sm:$0xff] %v618_v50  ;;  %v619_v55 = vmax.f32 %v580_v51, 0.0  ;;  %v741_v56 = vadd.f32 %v740_v54, %v739_v52  ;;  %v798_v57 = vpop.f32.mrb[13].mxu1  ;;  %v742_v58 = vpop.f32.mrb[14].mxu0 }
 0x111   :  { %v799_v59 = vadd.f32 %v798_v57, %v797_v53  ;;  %v800_v60 = vpop.f32.mrb[14].mxu1  ;;  %v743_v61 = vpop.f32.mrb[15].mxu0 }
 0x112   :  { %632 = vst [vmem:[%s1147_s3 + $0x28] sm:$0xff] %v619_v55  ;;  %v497_v62 = vadd.f32 %v741_v56, %v1090_v0  ;;  %v744_v63 = vadd.f32 %v743_v61, %v742_v58  ;;  %v801_v1 = vpop.f32.mrb[15].mxu1 }
 0x113   :  { %v802_v2 = vadd.f32 %v801_v1, %v800_v60 }
 0x114   :  { %v585_v3 = vadd.f32 %v799_v59, %v497_v62  ;;  %v500_v4 = vadd.f32 %v744_v63, %v1090_v0 }
 0x116   :  { %v620_v5 = vmax.f32 %v585_v3, 0.0  ;;  %v588_v6 = vadd.f32 %v802_v2, %v500_v4  ;;  %v745_v7 = vpop.f32.mrb[16].mxu0 }
 0x117   :  { %v803_v8 = vpop.f32.mrb[16].mxu1  ;;  %v746_v9 = vpop.f32.mrb[17].mxu0 }
 0x118   :  { %633 = vst [vmem:[%s1147_s3 + $0x30] sm:$0xff] %v620_v5  ;;  %v621_v10 = vmax.f32 %v588_v6, 0.0  ;;  %v747_v11 = vadd.f32 %v746_v9, %v745_v7  ;;  %v804_v12 = vpop.f32.mrb[17].mxu1  ;;  %v748_v13 = vpop.f32.mrb[18].mxu0 }
 0x119   :  { %v805_v14 = vadd.f32 %v804_v12, %v803_v8  ;;  %v806_v15 = vpop.f32.mrb[18].mxu1  ;;  %v749_v16 = vpop.f32.mrb[19].mxu0 }
 0x11a   :  { %634 = vst [vmem:[%s1147_s3 + $0x38] sm:$0xff] %v621_v10  ;;  %v505_v17 = vadd.f32 %v747_v11, %v1090_v0  ;;  %v750_v18 = vadd.f32 %v749_v16, %v748_v13  ;;  %v807_v19 = vpop.f32.mrb[19].mxu1 }
 0x11b   :  { %v808_v20 = vadd.f32 %v807_v19, %v806_v15 }
 0x11c   :  { %v593_v21 = vadd.f32 %v805_v14, %v505_v17  ;;  %v508_v22 = vadd.f32 %v750_v18, %v1090_v0 }
 0x11e   :  { %v622_v23 = vmax.f32 %v593_v21, 0.0  ;;  %v596_v24 = vadd.f32 %v808_v20, %v508_v22  ;;  %v751_v25 = vpop.f32.mrb[20].mxu0 }
 0x11f   :  { %v809_v26 = vpop.f32.mrb[20].mxu1  ;;  %v752_v27 = vpop.f32.mrb[21].mxu0 }
 0x120   :  { %635 = vst [vmem:[%s1147_s3 + $0x40] sm:$0xff] %v622_v23  ;;  %v623_v28 = vmax.f32 %v596_v24, 0.0  ;;  %v753_v29 = vadd.f32 %v752_v27, %v751_v25  ;;  %v810_v30 = vpop.f32.mrb[21].mxu1  ;;  %v754_v31 = vpop.f32.mrb[22].mxu0 }
 0x121   :  { %v811_v32 = vadd.f32 %v810_v30, %v809_v26  ;;  %v812_v33 = vpop.f32.mrb[22].mxu1  ;;  %v755_v34 = vpop.f32.mrb[23].mxu0 }
 0x122   :  { %636 = vst [vmem:[%s1147_s3 + $0x48] sm:$0xff] %v623_v28  ;;  %v513_v35 = vadd.f32 %v753_v29, %v1090_v0  ;;  %v756_v36 = vadd.f32 %v755_v34, %v754_v31  ;;  %v813_v37 = vpop.f32.mrb[23].mxu1 }
 0x123   :  { %v814_v38 = vadd.f32 %v813_v37, %v812_v33 }
 0x124   :  { %v601_v39 = vadd.f32 %v811_v32, %v513_v35  ;;  %v516_v40 = vadd.f32 %v756_v36, %v1090_v0 }
 0x126   :  { %v624_v41 = vmax.f32 %v601_v39, 0.0  ;;  %v604_v42 = vadd.f32 %v814_v38, %v516_v40  ;;  %v757_v43 = vpop.f32.mrb[24].mxu0 }
 0x127   :  { %v815_v44 = vpop.f32.mrb[24].mxu1  ;;  %v758_v45 = vpop.f32.mrb[25].mxu0 }
 0x128   :  { %637 = vst [vmem:[%s1147_s3 + $0x50] sm:$0xff] %v624_v41  ;;  %v625_v46 = vmax.f32 %v604_v42, 0.0  ;;  %v759_v47 = vadd.f32 %v758_v45, %v757_v43  ;;  %v816_v48 = vpop.f32.mrb[25].mxu1  ;;  %v760_v49 = vpop.f32.mrb[26].mxu0 }
 0x129   :  { %v817_v50 = vadd.f32 %v816_v48, %v815_v44  ;;  %v818_v51 = vpop.f32.mrb[26].mxu1  ;;  %v761_v52 = vpop.f32.mrb[27].mxu0 }
 0x12a   :  { %638 = vst [vmem:[%s1147_s3 + $0x58] sm:$0xff] %v625_v46  ;;  %v521_v53 = vadd.f32 %v759_v47, %v1090_v0  ;;  %v819_v54 = vpop.f32.mrb[27].mxu1 }
 0x12c   :  { %v609_v55 = vadd.f32 %v817_v50, %v521_v53 }
 0x12e   :  { %v626_v56 = vmax.f32 %v609_v55, 0.0 }
 0x130   :  { %639 = vst [vmem:[%s1147_s3 + $0x60] sm:$0xff] %v626_v56 }

// kernel: alex_bottom_forward.11
= control target key start
LH: loop header
LB: loop body
LE: loop exit
PB: predicated region body
PF: predicated region fallthrough
CT: control target
= control target key end

     0   :  { %s477_s15 = smov 0   ;;  %s523_s0 = inlined_call_operand.vmem [shape: f32[2,4,4,32], index: 0, kind: input, shape index: {}]   ;;  %s524_s1 = inlined_call_operand.vmem [shape: f32[2,4,4,32], index: 1, kind: input, shape index: {}]   ;;  %s525_s2 = inlined_call_operand.vmem [shape: f32[2,4,4,32], index: 2, kind: input, shape index: {}]   ;;  %s526_s3 = inlined_call_operand.vmem [shape: f32[2,4,4,32], index: 3, kind: input, shape index: {}]   ;;  %s527_s4 = inlined_call_operand.vmem [shape: f32[2,3,3,32], index: 4, kind: output, shape index: {}]  }
   0x1 LB: > { %s406_s16 = sadd.s32 4294967295, %s450_s15   ;;  %p410_p0 = scmp.ge.s32.totalorder %s450_s15, 1  ;;  %s450_s15 = sphi %s477_s15, %s14_s15  }
   0x2   : > { %p192_p1 = scmp.lt.s32.totalorder %s450_s15, 3 }
   0x4   : > { %p193_p2 = pnand %p410_p0, %p192_p1 }
   0x5   : > { %p233_p3 = scmp.lt.s32.totalorder (!%p193_p2), %s406_s16, 1  ;;  %vm311_vm0 = vcmask (!%p193_p2), 256000  }
   0x6   : > { %196 = sbr.rel (%p193_p2) target bundleno = 37 (0x25), region = 36 }
   0xd   : > { %s529_s16 = smov (!%p233_p3, %s406_s16), 1 }
   0xe   : > { %s431_s17 = sshll.u32 %s529_s16, 4  ;;  %s435_s30 = smul.u32 12, %s529_s16 }
   0xf   : > { %s237_s20 = scalar_lea.vmem %s523_s0, %s431_s17  ;;  %s494_s23 = scalar_lea.vmem %s524_s1, %s431_s17 }
  0x10   : > { %v258_v0 = vld [vmem:[%s237_s20] sm:$0x7]  ;;  %v420_v2 = vld [vmem:[%s237_s20 + $0x4] sm:$0x7]  ;;  %v421_v8 = vld [vmem:[%s237_s20 + $0x8] sm:$0x7]  ;;  %s500_s26 = scalar_lea.vmem %s525_s2, %s431_s17  ;;  %s252_s29 = scalar_lea.vmem %s526_s3, %s431_s17 }
  0x11   : > { %v261_v1 = vld [vmem:[%s237_s20 + $0x1] sm:$0x7]  ;;  %v423_v4 = vld [vmem:[%s237_s20 + $0x5] sm:$0x7]  ;;  %v424_v13 = vld [vmem:[%s237_s20 + $0x9] sm:$0x7]  ;;  %s257_s7 = scalar_lea.vmem %s527_s4, %s435_s30 }
  0x12   : > { %v264_v3 = vmax.f32 %v258_v0, %v261_v1  ;;  %v259_v6 = vld [vmem:[%s237_s20 + $0x4] sm:$0x7]  ;;  %v280_v9 = vld [vmem:[%s494_s23] sm:$0x7]  ;;  %v260_v15 = vld [vmem:[%s237_s20 + $0x8] sm:$0x7] }
  0x13   : > { %v262_v7 = vld [vmem:[%s237_s20 + $0x5] sm:$0x7]  ;;  %v263_v16 = vld [vmem:[%s237_s20 + $0x9] sm:$0x7]  ;;  %v422_v17 = vld [vmem:[%s237_s20 + $0xc] sm:$0x7] }
  0x14   : > { %v271_v5 = vmax.f32 %v264_v3, %v420_v2  ;;  %v265_v10 = vmax.f32 %v259_v6, %v262_v7  ;;  %v426_v12 = vld [vmem:[%s494_s23 + $0x4] sm:$0x7]  ;;  %v266_v20 = vmax.f32 %v260_v15, %v263_v16  ;;  %v293_v21 = vld [vmem:[%s500_s26] sm:$0x7]  ;;  %v425_v23 = vld [vmem:[%s237_s20 + $0xd] sm:$0x7] }
  0x15   : > { %v281_v19 = vld [vmem:[%s494_s23 + $0x4] sm:$0x7]  ;;  %v427_v25 = vld [vmem:[%s494_s23 + $0x8] sm:$0x7]  ;;  %v299_v27 = vld [vmem:[%s500_s26 + $0x1] sm:$0x7] }
  0x16   : > { %v277_v11 = vmax.f32 %v271_v5, %v423_v4  ;;  %v272_v14 = vmax.f32 %v265_v10, %v421_v8  ;;  %v273_v26 = vmax.f32 %v266_v20, %v422_v17  ;;  %v282_v29 = vld [vmem:[%s494_s23 + $0x8] sm:$0x7]  ;;  %v294_v31 = vld [vmem:[%s500_s26 + $0x4] sm:$0x7]  ;;  %v305_v33 = vld [vmem:[%s252_s29] sm:$0x7] }
  0x17   : > { %v428_v35 = vld [vmem:[%s494_s23 + $0xc] sm:$0x7]  ;;  %v300_v37 = vld [vmem:[%s500_s26 + $0x5] sm:$0x7]  ;;  %v295_v40 = vld [vmem:[%s500_s26 + $0x8] sm:$0x7] }
  0x18   : > { %v283_v18 = vmax.f32 %v277_v11, %v280_v9  ;;  %v278_v22 = vmax.f32 %v272_v14, %v424_v13  ;;  %v279_v32 = vmax.f32 %v273_v26, %v425_v23  ;;  %v306_v42 = vld [vmem:[%s252_s29 + $0x4] sm:$0x7]  ;;  %v301_v45 = vld [vmem:[%s500_s26 + $0x9] sm:$0x7] }
  0x19   : > { %v307_v48 = vld [vmem:[%s252_s29 + $0x8] sm:$0x7] }
  0x1a   : > { %v290_v24 = vmax.f32 %v283_v18, %v426_v12  ;;  %v284_v28 = vmax.f32 %v278_v22, %v281_v19  ;;  %v285_v38 = vmax.f32 %v279_v32, %v282_v29 }
  0x1c   : > { %v296_v30 = vmax.f32 %v290_v24, %v293_v21  ;;  %v291_v34 = vmax.f32 %v284_v28, %v427_v25  ;;  %v292_v43 = vmax.f32 %v285_v38, %v428_v35 }
  0x1e   : > { %v302_v36 = vmax.f32 %v296_v30, %v299_v27  ;;  %v297_v39 = vmax.f32 %v291_v34, %v294_v31  ;;  %v298_v46 = vmax.f32 %v292_v43, %v295_v40 }
  0x20   : > { %v308_v41 = vmax.f32 %v302_v36, %v305_v33  ;;  %v303_v44 = vmax.f32 %v297_v39, %v300_v37  ;;  %v304_v49 = vmax.f32 %v298_v46, %v301_v45 }
  0x22   : > { %312 = vst.msk [vmem:[%s257_s7] sm:$0x7] %vm311_vm0, %v308_v41  ;;  %v309_v47 = vmax.f32 %v303_v44, %v306_v42  ;;  %v310_v50 = vmax.f32 %v304_v49, %v307_v48 }
  0x24   : > { %313 = vst.msk [vmem:[%s257_s7 + $0x4] sm:$0x7] %vm311_vm0, %v309_v47  ;;  %314 = vst.msk [vmem:[%s257_s7 + $0x8] sm:$0x7] %vm311_vm0, %v310_v50 }
  0x25 PF: > { %s14_s15 = sadd.s32 1, %s450_s15  }
  0x26   : > { %p11_p4 = scmp.ge.s32.totalorder %s14_s15, 4  }
  0x28   :  { %13 = sbr.rel (!%p11_p4) target bundleno = 1 (0x1), region = 77 }

// kernel: alex_bottom_forward.12
= control target key start
LH: loop header
LB: loop body
LE: loop exit
PB: predicated region body
PF: predicated region fallthrough
CT: control target
= control target key end

     0   :  { %s592_s1 = inlined_call_operand.vmem [shape: bf16[384,128], index: 1, kind: input, shape index: {}]   ;;  %s593_s0 = inlined_call_operand.vmem [shape: bf16[24,384], index: 0, kind: input, shape index: {}]   ;;  %s594_s2 = inlined_call_operand.vmem [shape: f32[1,128], index: 2, kind: input, shape index: {}]   ;;  %s595_s3 = inlined_call_operand.vmem [shape: f32[24,128], index: 3, kind: output, shape index: {}]  }
   0x1   :  { %v442_v0 = vld [vmem:[%s592_s1 + $0x40] sm:$0xff]   ;;  %v444_v2 = vld [vmem:[%s592_s1 + $0x48] sm:$0xff]   ;;  %v447_v5 = vld [vmem:[%s592_s1 + $0x50] sm:$0xff]  }
   0x2   :  { %v443_v1 = vld [vmem:[%s592_s1] sm:$0xff]   ;;  %384 = vmatprep.subr.bf16.mxu0 %v442_v0  ;;  %v446_v4 = vld [vmem:[%s592_s1 + $0x8] sm:$0xff]   ;;  %v449_v7 = vld [vmem:[%s592_s1 + $0x10] sm:$0xff]  }
   0x3   :  { %385 = vmatpush3.bf16.msra.mxu0 %v443_v1  ;;  %v445_v3 = vld [vmem:[%s592_s1 + $0x80] sm:$0xff]   ;;  %v448_v6 = vld [vmem:[%s592_s1 + $0x88] sm:$0xff]   ;;  %v450_v8 = vld [vmem:[%s592_s1 + $0x58] sm:$0xff]  }
   0x4   :  { %386 = vmatprep.subr.bf16.mxu0 %v444_v2  ;;  %422 = vmatprep.subr.bf16.mxu1 %v445_v3  ;;  %v451_v9 = vld [vmem:[%s592_s1 + $0x90] sm:$0xff]   ;;  %v452_v10 = vld [vmem:[%s592_s1 + $0x18] sm:$0xff]   ;;  %v453_v11 = vld [vmem:[%s592_s1 + $0x60] sm:$0xff]  }
   0x5   :  { %423 = vmatpush3.bf16.msra.mxu1 %v445_v3  ;;  %v454_v12 = vld [vmem:[%s592_s1 + $0x98] sm:$0xff]   ;;  %v455_v13 = vld [vmem:[%s592_s1 + $0x20] sm:$0xff]   ;;  %v456_v15 = vld [vmem:[%s592_s1 + $0x68] sm:$0xff]  }
   0x6   :  { %424 = vmatprep.subr.bf16.mxu1 %v448_v6  ;;  %v457_v14 = vld [vmem:[%s592_s1 + $0xa0] sm:$0xff]   ;;  %v458_v16 = vld [vmem:[%s592_s1 + $0x28] sm:$0xff]   ;;  %v459_v18 = vld [vmem:[%s592_s1 + $0x70] sm:$0xff]  }
   0x7   :  { %387 = vmatpush3.bf16.msra.mxu0 %v446_v4  ;;  %v460_v17 = vld [vmem:[%s592_s1 + $0xa8] sm:$0xff]   ;;  %v461_v19 = vld [vmem:[%s592_s1 + $0x30] sm:$0xff]   ;;  %v462_v20 = vld [vmem:[%s592_s1 + $0x78] sm:$0xff]  }
   0x8   :  { %388 = vmatprep.subr.bf16.mxu0 %v447_v5  ;;  %v463_v21 = vld [vmem:[%s592_s1 + $0xb0] sm:$0xff]   ;;  %v464_v24 = vld [vmem:[%s592_s1 + $0x38] sm:$0xff]   ;;  %v465_v27 = vld [vmem:[%s593_s0] ss:$12 sps:$4 sm:$0xff]  }
   0x9   :  { %425 = vmatpush3.bf16.msra.mxu1 %v448_v6  ;;  %v467_v22 = vld [vmem:[%s593_s0 + $0x4] ss:$12 sps:$4 sm:$0xff]   ;;  %v469_v23 = vld [vmem:[%s593_s0 + $0x8] ss:$12 sps:$4 sm:$0xff]   ;;  %v468_v25 = vld [vmem:[%s592_s1 + $0xb8] sm:$0xff]  }
   0xa   :  { %426 = vmatprep.subr.bf16.mxu1 %v451_v9  ;;  %279 = vmatprep.mubr.bf16.mxu0 %v467_v22  ;;  %v19_v26 = vld [vmem:[%s593_s0 + $0x18] sm:$0xff]  ;;  %v470_v29 = vld [vmem:[%s593_s0 + $0x20] ss:$0 sps:$4 sm:$0xff]  }
   0xb   :  { %389 = vmatpush3.bf16.msra.mxu0 %v449_v7  ;;  %438 = vmatprep.mubr.bf16.mxu1 %v469_v23  ;;  %v358_v28 = vcombine.high %v19_v26, %v19_v26  ;;  %v357_v30 = vcombine.low %v19_v26, %v19_v26  ;;  %v353_v33 = vld [vmem:[%s594_s2] ss:$0 sm:$0xff] }
   0xc   :  { %390 = vmatprep.subr.bf16.mxu0 %v450_v8 }
   0xd   :  { %427 = vmatpush3.bf16.msra.mxu1 %v451_v9 }
   0xe   :  { %428 = vmatprep.subr.bf16.mxu1 %v454_v12 }
   0xf   :  { %391 = vmatpush3.bf16.msra.mxu0 %v452_v10 }
  0x10   :  { %392 = vmatprep.subr.bf16.mxu0 %v453_v11 }
  0x11   :  { %429 = vmatpush3.bf16.msra.mxu1 %v454_v12 }
  0x12   :  { %430 = vmatprep.subr.bf16.mxu1 %v457_v14 }
  0x13   :  { %393 = vmatpush3.bf16.msra.mxu0 %v455_v13 }
  0x14   :  { %394 = vmatprep.subr.bf16.mxu0 %v456_v15 }
  0x15   :  { %431 = vmatpush3.bf16.msra.mxu1 %v457_v14 }
  0x16   :  { %432 = vmatprep.subr.bf16.mxu1 %v460_v17 }
  0x17   :  { %395 = vmatpush3.bf16.msra.mxu0 %v458_v16 }
  0x18   :  { %396 = vmatprep.subr.bf16.mxu0 %v459_v18 }
  0x19   :  { %433 = vmatpush3.bf16.msra.mxu1 %v460_v17 }
  0x1a   :  { %434 = vmatprep.subr.bf16.mxu1 %v463_v21 }
  0x1b   :  { %397 = vmatpush3.bf16.msra.mxu0 %v461_v19 }
  0x1c   :  { %398 = vmatprep.subr.bf16.mxu0 %v462_v20 }
  0x1d   :  { %435 = vmatpush3.bf16.msra.mxu1 %v463_v21 }
  0x1e   :  { %436 = vmatprep.subr.bf16.mxu1 %v468_v25 }
  0x1f   :  { %399 = vmatpush3.bf16.msra.mxu0 %v464_v24 }
  0x21   :  { %437 = vmatpush3.bf16.msra.mxu1 %v468_v25 }
  0x22   :  { %280 = vmatmul.mubr.bf16.vlgmr.msra.gmra.mrb[0].mxu0 %v465_v27 }
  0x23   :  { %287 = vmatprep.mubr.bf16.mxu0 %v358_v28 }
  0x24   :  { %439 = vmatmul.mubr.bf16.vlgmr.msra.gmra.mrb[0].mxu1 %v470_v29 }
  0x2a   :  { %288 = vmatmul.mubr.bf16.gmra.mrb[4].mxu0 %v357_v30 }
  0xf5   :  { %v400_v31 = vpop.f32.mrb[0].mxu0 }
  0xf6   :  { %v401_v32 = vpop.f32.mrb[1].mxu0 }
  0xf7   :  { %v402_v34 = vadd.f32 %v401_v32, %v400_v31  ;;  %v403_v35 = vpop.f32.mrb[2].mxu0  ;;  %v440_v37 = vpop.f32.mrb[0].mxu1 }
  0xf8   :  { %v404_v36 = vpop.f32.mrb[3].mxu0  ;;  %v329_v40 = vpop.f32.mrb[1].mxu1 }
  0xf9   :  { %v405_v38 = vadd.f32 %v404_v36, %v403_v35  ;;  %v282_v39 = vadd.f32 %v402_v34, %v353_v33  ;;  %v441_v41 = vpop.f32.mrb[2].mxu1 }
  0xfa   :  { %v332_v44 = vpop.f32.mrb[3].mxu1 }
  0xfb   :  { %v330_v42 = vadd.f32 %v329_v40, %v282_v39  ;;  %v285_v43 = vadd.f32 %v405_v38, %v353_v33 }
  0xfd   :  { %v343_v45 = vmax.f32 %v330_v42, 0.0  ;;  %v333_v46 = vadd.f32 %v332_v44, %v285_v43  ;;  %v406_v47 = vpop.f32.mrb[4].mxu0 }
  0xfe   :  { %v407_v48 = vpop.f32.mrb[5].mxu0 }
  0xff   :  { %346 = vst [vmem:[%s595_s3] sm:$0xff] %v343_v45  ;;  %v344_v49 = vmax.f32 %v333_v46, 0.0  ;;  %v408_v50 = vadd.f32 %v407_v48, %v406_v47  ;;  %v409_v51 = vpop.f32.mrb[6].mxu0 }
 0x100   :  { %v410_v52 = vpop.f32.mrb[7].mxu0 }
 0x101   :  { %347 = vst [vmem:[%s595_s3 + $0x8] sm:$0xff] %v344_v49  ;;  %v290_v53 = vadd.f32 %v408_v50, %v353_v33 }
 0x103   :  { %v338_v54 = vadd.f32 %v440_v37, %v290_v53 }
 0x105   :  { %v345_v55 = vmax.f32 %v338_v54, 0.0 }
 0x107   :  { %348 = vst [vmem:[%s595_s3 + $0x10] sm:$0xff] %v345_v55 }

// kernel: alex_bottom_forward.13
= control target key start
LH: loop header
LB: loop body
LE: loop exit
PB: predicated region body
PF: predicated region fallthrough
CT: control target
= control target key end

     0   :  { %s709_s1 = inlined_call_operand.vmem [shape: bf16[512,128], index: 1, kind: input, shape index: {}]   ;;  %s710_s0 = inlined_call_operand.vmem [shape: bf16[24,512], index: 0, kind: input, shape index: {}]   ;;  %s711_s2 = inlined_call_operand.vmem [shape: f32[1,128], index: 2, kind: input, shape index: {}]   ;;  %s712_s3 = inlined_call_operand.vmem [shape: f32[24,128], index: 3, kind: output, shape index: {}]  }
   0x1   :  { %v521_v0 = vld [vmem:[%s709_s1 + $0x40] sm:$0xff]   ;;  %v525_v4 = vld [vmem:[%s709_s1 + $0x48] sm:$0xff]   ;;  %v529_v8 = vld [vmem:[%s709_s1 + $0x50] sm:$0xff]  }
   0x2   :  { %v522_v1 = vld [vmem:[%s709_s1 + $0xc0] sm:$0xff]   ;;  %465 = vmatprep.subr.bf16.mxu0 %v521_v0  ;;  %v526_v5 = vld [vmem:[%s709_s1 + $0xc8] sm:$0xff]   ;;  %v530_v9 = vld [vmem:[%s709_s1 + $0xd0] sm:$0xff]  }
   0x3   :  { %v523_v2 = vld [vmem:[%s709_s1] sm:$0xff]   ;;  %493 = vmatprep.subr.bf16.mxu1 %v522_v1  ;;  %v527_v6 = vld [vmem:[%s709_s1 + $0x8] sm:$0xff]   ;;  %v531_v10 = vld [vmem:[%s709_s1 + $0x10] sm:$0xff]  }
   0x4   :  { %v524_v3 = vld [vmem:[%s709_s1 + $0x80] sm:$0xff]   ;;  %466 = vmatpush3.bf16.msra.mxu0 %v523_v2  ;;  %v528_v7 = vld [vmem:[%s709_s1 + $0x88] sm:$0xff]   ;;  %v532_v11 = vld [vmem:[%s709_s1 + $0x90] sm:$0xff]  }
   0x5   :  { %494 = vmatpush3.bf16.msra.mxu1 %v524_v3  ;;  %467 = vmatprep.subr.bf16.mxu0 %v525_v4  ;;  %v533_v12 = vld [vmem:[%s709_s1 + $0x58] sm:$0xff]   ;;  %v537_v16 = vld [vmem:[%s709_s1 + $0x60] sm:$0xff]   ;;  %v541_v20 = vld [vmem:[%s709_s1 + $0x68] sm:$0xff]  }
   0x6   :  { %495 = vmatprep.subr.bf16.mxu1 %v526_v5  ;;  %v534_v13 = vld [vmem:[%s709_s1 + $0xd8] sm:$0xff]   ;;  %v538_v17 = vld [vmem:[%s709_s1 + $0xe0] sm:$0xff]   ;;  %v542_v21 = vld [vmem:[%s709_s1 + $0xe8] sm:$0xff]  }
   0x7   :  { %v535_v14 = vld [vmem:[%s709_s1 + $0x18] sm:$0xff]   ;;  %v539_v18 = vld [vmem:[%s709_s1 + $0x20] sm:$0xff]   ;;  %v543_v22 = vld [vmem:[%s709_s1 + $0x28] sm:$0xff]  }
   0x8   :  { %468 = vmatpush3.bf16.msra.mxu0 %v527_v6  ;;  %v536_v15 = vld [vmem:[%s709_s1 + $0x98] sm:$0xff]   ;;  %v540_v19 = vld [vmem:[%s709_s1 + $0xa0] sm:$0xff]   ;;  %v544_v23 = vld [vmem:[%s709_s1 + $0xa8] sm:$0xff]  }
   0x9   :  { %496 = vmatpush3.bf16.msra.mxu1 %v528_v7  ;;  %469 = vmatprep.subr.bf16.mxu0 %v529_v8  ;;  %v545_v24 = vld [vmem:[%s709_s1 + $0x70] sm:$0xff]   ;;  %v549_v28 = vld [vmem:[%s709_s1 + $0x78] sm:$0xff]   ;;  %v19_v36 = vld [vmem:[%s710_s0 + $0x20] sm:$0xff] }
   0xa   :  { %497 = vmatprep.subr.bf16.mxu1 %v530_v9  ;;  %v546_v25 = vld [vmem:[%s709_s1 + $0xf0] sm:$0xff]   ;;  %v550_v29 = vld [vmem:[%s709_s1 + $0xf8] sm:$0xff]   ;;  %v430_v37 = vcombine.high %v19_v36, %v19_v36  ;;  %v20_v38 = vld [vmem:[%s710_s0 + $0x28] sm:$0xff]  ;;  %v429_v40 = vcombine.low %v19_v36, %v19_v36 }
   0xb   :  { %v547_v26 = vld [vmem:[%s709_s1 + $0x30] sm:$0xff]   ;;  %v551_v30 = vld [vmem:[%s709_s1 + $0x38] sm:$0xff]   ;;  %v432_v39 = vcombine.high %v20_v38, %v20_v38  ;;  %v431_v41 = vcombine.low %v20_v38, %v20_v38  ;;  %v424_v44 = vld [vmem:[%s711_s2] ss:$0 sm:$0xff] }
   0xc   :  { %470 = vmatpush3.bf16.msra.mxu0 %v531_v10  ;;  %v548_v27 = vld [vmem:[%s709_s1 + $0xb0] sm:$0xff]   ;;  %v552_v31 = vld [vmem:[%s709_s1 + $0xb8] sm:$0xff]  }
   0xd   :  { %498 = vmatpush3.bf16.msra.mxu1 %v532_v11  ;;  %471 = vmatprep.subr.bf16.mxu0 %v533_v12  ;;  %v553_v32 = vld [vmem:[%s710_s0] ss:$16 sps:$4 sm:$0xff]   ;;  %v555_v33 = vld [vmem:[%s710_s0 + $0x4] ss:$16 sps:$4 sm:$0xff]   ;;  %v556_v34 = vld [vmem:[%s710_s0 + $0x8] ss:$16 sps:$4 sm:$0xff]  }
   0xe   :  { %499 = vmatprep.subr.bf16.mxu1 %v534_v13  ;;  %v558_v35 = vld [vmem:[%s710_s0 + $0xc] ss:$16 sps:$4 sm:$0xff]   ;;  %350 = vmatprep.mubr.bf16.mxu0 %v555_v33 }
   0xf   :  { %398 = vmatprep.mubr.bf16.mxu1 %v558_v35 }
  0x10   :  { %472 = vmatpush3.bf16.msra.mxu0 %v535_v14 }
  0x11   :  { %500 = vmatpush3.bf16.msra.mxu1 %v536_v15  ;;  %473 = vmatprep.subr.bf16.mxu0 %v537_v16 }
  0x12   :  { %501 = vmatprep.subr.bf16.mxu1 %v538_v17 }
  0x14   :  { %474 = vmatpush3.bf16.msra.mxu0 %v539_v18 }
  0x15   :  { %502 = vmatpush3.bf16.msra.mxu1 %v540_v19  ;;  %475 = vmatprep.subr.bf16.mxu0 %v541_v20 }
  0x16   :  { %503 = vmatprep.subr.bf16.mxu1 %v542_v21 }
  0x18   :  { %476 = vmatpush3.bf16.msra.mxu0 %v543_v22 }
  0x19   :  { %504 = vmatpush3.bf16.msra.mxu1 %v544_v23  ;;  %477 = vmatprep.subr.bf16.mxu0 %v545_v24 }
  0x1a   :  { %505 = vmatprep.subr.bf16.mxu1 %v546_v25 }
  0x1c   :  { %478 = vmatpush3.bf16.msra.mxu0 %v547_v26 }
  0x1d   :  { %506 = vmatpush3.bf16.msra.mxu1 %v548_v27  ;;  %479 = vmatprep.subr.bf16.mxu0 %v549_v28 }
  0x1e   :  { %507 = vmatprep.subr.bf16.mxu1 %v550_v29 }
  0x20   :  { %480 = vmatpush3.bf16.msra.mxu0 %v551_v30 }
  0x21   :  { %508 = vmatpush3.bf16.msra.mxu1 %v552_v31 }
  0x23   :  { %351 = vmatmul.mubr.bf16.vlgmr.msra.gmra.mrb[0].mxu0 %v553_v32 }
  0x24   :  { %399 = vmatmul.mubr.bf16.vlgmr.msra.gmra.mrb[0].mxu1 %v556_v34  ;;  %358 = vmatprep.mubr.bf16.mxu0 %v430_v37 }
  0x25   :  { %406 = vmatprep.mubr.bf16.mxu1 %v432_v39 }
  0x2b   :  { %359 = vmatmul.mubr.bf16.gmra.mrb[4].mxu0 %v429_v40 }
  0x2c   :  { %407 = vmatmul.mubr.bf16.gmra.mrb[4].mxu1 %v431_v41 }
  0xf6   :  { %v481_v42 = vpop.f32.mrb[0].mxu0 }
  0xf7   :  { %v509_v43 = vpop.f32.mrb[0].mxu1  ;;  %v482_v45 = vpop.f32.mrb[1].mxu0 }
  0xf8   :  { %v483_v46 = vadd.f32 %v482_v45, %v481_v42  ;;  %v510_v47 = vpop.f32.mrb[1].mxu1  ;;  %v484_v48 = vpop.f32.mrb[2].mxu0 }
  0xf9   :  { %v511_v49 = vadd.f32 %v510_v47, %v509_v43  ;;  %v512_v50 = vpop.f32.mrb[2].mxu1  ;;  %v485_v51 = vpop.f32.mrb[3].mxu0 }
  0xfa   :  { %v353_v52 = vadd.f32 %v483_v46, %v424_v44  ;;  %v486_v53 = vadd.f32 %v485_v51, %v484_v48  ;;  %v513_v54 = vpop.f32.mrb[3].mxu1 }
  0xfb   :  { %v514_v55 = vadd.f32 %v513_v54, %v512_v50 }
  0xfc   :  { %v401_v56 = vadd.f32 %v511_v49, %v353_v52  ;;  %v356_v57 = vadd.f32 %v486_v53, %v424_v44 }
  0xfe   :  { %v414_v58 = vmax.f32 %v401_v56, 0.0  ;;  %v404_v59 = vadd.f32 %v514_v55, %v356_v57  ;;  %v487_v60 = vpop.f32.mrb[4].mxu0 }
  0xff   :  { %v515_v61 = vpop.f32.mrb[4].mxu1  ;;  %v488_v62 = vpop.f32.mrb[5].mxu0 }
 0x100   :  { %417 = vst [vmem:[%s712_s3] sm:$0xff] %v414_v58  ;;  %v415_v63 = vmax.f32 %v404_v59, 0.0  ;;  %v489_v0 = vadd.f32 %v488_v62, %v487_v60  ;;  %v516_v1 = vpop.f32.mrb[5].mxu1  ;;  %v490_v2 = vpop.f32.mrb[6].mxu0 }
 0x101   :  { %v517_v3 = vadd.f32 %v516_v1, %v515_v61  ;;  %v518_v4 = vpop.f32.mrb[6].mxu1  ;;  %v491_v5 = vpop.f32.mrb[7].mxu0 }
 0x102   :  { %418 = vst [vmem:[%s712_s3 + $0x8] sm:$0xff] %v415_v63  ;;  %v361_v6 = vadd.f32 %v489_v0, %v424_v44  ;;  %v519_v7 = vpop.f32.mrb[7].mxu1 }
 0x104   :  { %v409_v8 = vadd.f32 %v517_v3, %v361_v6 }
 0x106   :  { %v416_v9 = vmax.f32 %v409_v8, 0.0 }
 0x108   :  { %419 = vst [vmem:[%s712_s3 + $0x10] sm:$0xff] %v416_v9 }

// kernel: alex_bottom_forward.15
= control target key start
LH: loop header
LB: loop body
LE: loop exit
PB: predicated region body
PF: predicated region fallthrough
CT: control target
= control target key end

     0   :  { %9 = vsyncpa [#allocation3], 0  ;;  %s640_s0 = inlined_call_operand.vmem [shape: f32[2,2,2,32], index: 0, kind: input, shape index: {}]   ;;  %s641_s1 = inlined_call_operand.vmem [shape: f32[2,2,2,32], index: 1, kind: input, shape index: {}]   ;;  %s642_s2 = inlined_call_operand.vmem [shape: f32[2,2,2,32], index: 2, kind: input, shape index: {}]   ;;  %s643_s3 = inlined_call_operand.vmem [shape: f32[2,2,2,32], index: 3, kind: input, shape index: {}]   ;;  %s644_s4 = inlined_call_operand.hbm [shape: f32[2,1,1,32], index: 4, kind: output, shape index: {}]  }
   0x1   :  { %11 = vsyncpa [#allocation3 + $0x1], 0  ;;  %s531_s15 = smov 0   ;;  %s533_s16 = smov 0  }
   0x2   :  { %s535_s17 = smov 0   ;;  %s537_s18 = smov 0  }
   0x3 LB: > { %s552_s19 = sadd.s32 4294967295, %s503_s18   ;;  %s380_s20 = sadd.s32 4294967294, %s503_s18   ;;  %s503_s18 = sphi %s537_s18, %s650_s18   ;;  %s499_s17 = sphi %s535_s17, %s649_s17   ;;  %s495_s16 = sphi %s533_s16, %s648_s16   ;;  %s491_s15 = sphi %s531_s15, %s647_s15  }
   0x4   : > { %s556_s21 = sadd.s32 1, %s503_s18   ;;  %s128_s22 = sadd.s32 1, %s499_s17 }
   0x5   : > { %s125_s23 = ssub.s32 %s503_s18, %s556_s21  ;;  %p138_p0 = scmp.ne.s32.totalorder %s499_s17, %s495_s16 }
   0x6   : > { %p126_p1 = scmp.eq.s32.totalorder %s125_s23, 0  ;;  %p139_p2 = scmp.eq.s32.totalorder %s552_s19, 1 }
   0x7   : > { %p144_p3 = scmp.ne.s32.totalorder %s495_s16, %s491_s15  ;;  %p145_p4 = scmp.eq.s32.totalorder %s380_s20, 1 }
   0x8   : > { %s567_s24 = scalar_select %p126_p1, %s499_s17, %s128_s22  }
   0x9   : > { %p569_p5 = por %p139_p2, %p138_p0  ;;  %p573_p6 = por %p145_p4, %p144_p3 }
   0xa   : > { %p383_p7 = scmp.ge.s32.totalorder %s503_s18, 1  ;;  %p195_p8 = scmp.lt.s32.totalorder %s503_s18, 3 }
   0xc   : > { %p196_p9 = pnand %p383_p7, %p195_p8 }
   0xd   : > { %p235_p10 = scmp.lt.s32.totalorder (!%p196_p9), %s552_s19, 1  ;;  %s233_s12 = sand.u32 (!%p196_p9), 1, %s495_s16   ;;  %vm274_vm0 = vcmask (!%p196_p9), 253952  }
   0xe   : > { %199 = sbr.rel (%p196_p9) target bundleno = 56 (0x38), region = 36  ;;  %s234_s22 = scalar_lea.vmem (!%p196_p9), [#allocation2], %s233_s12 }
   0xf   : > { %s289_s23 = sshll.u32 (!%p196_p9), %s234_s22, 4  ;;  %s595_s23 = int_to_ptr.vmem [resolvable:$true] %s289_s23 }
  0x10   : > { %s441_s6 = scalar_lea.vmem (!%p196_p9), %s595_s23, 16 }
  0x11   : > { %p442_p11 = scmp.ne.s32.totalorder (!%p196_p9), %s595_s23, %s441_s6 }
  0x13   : > { %p443_p12 = pnand (!%p196_p9), %p442_p11, %p569_p5 }
  0x15   : > { %s236_s27 = scalar_select %p235_p10, %s552_s19, 1 }
  0x16   : > { %p444_p13 = pneg %p443_p12 }
  0x17   : > { %s398_s28 = sshll.u32 %s236_s27, 2  ;;  %s395_s27 = sshll.u32 %s552_s19, 4 }
  0x18   : > { %s239_s5 = scalar_lea.vmem %s640_s0, %s398_s28  ;;  %s244_s8 = scalar_lea.vmem %s641_s1, %s398_s28 }
  0x19   : > { %v255_v0 = vld [vmem:[%s239_s5] sm:$0x1]  ;;  %v256_v1 = vld [vmem:[%s239_s5 + $0x1] sm:$0x1]  ;;  %v392_v2 = vld [vmem:[%s239_s5 + $0x2] sm:$0x1]  ;;  %s249_s11 = scalar_lea.vmem %s642_s2, %s398_s28  ;;  %s254_s20 = scalar_lea.vmem %s643_s3, %s398_s28 }
  0x1a   : > { %v257_v3 = vmax.f32 %v255_v0, %v256_v1  ;;  %v393_v4 = vld [vmem:[%s239_s5 + $0x3] sm:$0x1]  ;;  %v263_v6 = vld [vmem:[%s244_s8] sm:$0x1]  ;;  %v394_v8 = vld [vmem:[%s244_s8 + $0x2] sm:$0x1]  ;;  %s600_s28 = scalar_lea.hbm %s644_s4, %s395_s27 }
  0x1b   : > { %v268_v10 = vld [vmem:[%s249_s11] sm:$0x1]  ;;  %v270_v12 = vld [vmem:[%s249_s11 + $0x1] sm:$0x1]  ;;  %s277_s5 = scalar_lea.sflag [#allocation3], %s233_s12  ;;  %s505_s19 = smov [#allocation2]  }
  0x1c   : > { %v260_v5 = vmax.f32 %v257_v3, %v392_v2  ;;  %v272_v14 = vld [vmem:[%s254_s20] sm:$0x1]  ;;  %s445_s7 = sshll.u32 %s505_s19, 4  ;;  %s446_s7 = int_to_ptr.vmem [resolvable:$false] %s445_s7 }
  0x1d   : > { %s447_s8 = scalar_lea.vmem %s446_s7, 32  ;;  %p448_p0 = scmp.lt.s32.totalorder %s595_s23, %s446_s7 }
  0x1e   : > { %v262_v7 = vmax.f32 %v260_v5, %v393_v4  ;;  %p449_p1 = scmp.lt.s32.totalorder %s447_s8, %s441_s6 }
  0x20   : > { %v264_v9 = vmax.f32 %v262_v7, %v263_v6  ;;  %p450_p2 = por %p449_p1, %p448_p0 }
  0x22   : > { %v267_v11 = vmax.f32 %v264_v9, %v394_v8  ;;  %p451_p3 = pnand %p450_p2, %p444_p13 }
  0x24   : > { %v269_v13 = vmax.f32 %v267_v11, %v268_v10 }
  0x26   : > { %v271_v15 = vmax.f32 %v269_v13, %v270_v12 }
  0x28   : > { %v273_v16 = vmax.f32 %v271_v15, %v272_v14 }
  0x2a   : > { %275 = vst.msk [vmem:[%s234_s22] sm:$0x1] %vm274_vm0, %v273_v16 }
  0x2b   : > { %454 = shalt.err (!%p451_p3)
}
  0x2c   : > { %s455_s9 = scalar_lea.hbm %s600_s28, 16  ;;  %s459_s12 = scalar_lea.hbm %s644_s4, 32 }
  0x2d   : > { %p456_p4 = scmp.ne.s32.totalorder %s600_s28, %s455_s9  ;;  %p460_p9 = scmp.lt.u32.totalorder %s600_s28, %s644_s4 }
  0x2e   : > { %p461_p10 = scmp.lt.u32.totalorder %s459_s12, %s455_s9  ;;  %p463_p12 = scmp.lt.u32.totalorder %s455_s9, %s600_s28 }
  0x2f   : > { %p457_p7 = pnand %p456_p4, %p569_p5 }
  0x30   : > { %p462_p11 = por %p461_p10, %p460_p9 }
  0x31   : > { %p458_p8 = pneg %p457_p7 }
  0x32   : > { %p464_p13 = por %p463_p12, %p462_p11 }
  0x34   : > { %p465_p0 = pnand %p464_p13, %p458_p8 }
  0x36   : > { %468 = shalt.err (!%p465_p0)
}
  0x37   : > { %402 = dma.vmem_to_hbm [thread:$0]  (%p569_p5), %s595_s23, 16, %s600_s28, %s277_s5  }
  0x38 PF: > { %p408_p1 = scmp.ge.s32.totalorder %s503_s18, 2  ;;  %s301_s20 = sand.u32 1, %s491_s15  }
  0x39   : > { %s302_s22 = scalar_lea.sflag [#allocation3], %s301_s20 }
  0x3a   : > { %p405_p2 = pnand %p408_p1, %p573_p6 }
  0x3c   : > { %486 = dma.done.wait (!%p405_p2), %s302_s22, 16  }
  0x3d   : > { %488 = vsyncadd (!%p405_p2), %s302_s22, 4294967280  ;;  %p14_p3 = scmp.ge.s32.totalorder %s556_s21, 4   ;;  %s647_s15 = smov %s495_s16 }
  0x3e   : > { %s648_s16 = smov %s499_s17  ;;  %s649_s17 = smov %s567_s24 }
  0x3f   : > { %s650_s18 = smov %s556_s21  ;;  %16 = sbr.rel (!%p14_p3) target bundleno = 3 (0x3), region = 82 }
  0x46   :  { %306 = vsyncpa [#allocation3], 1 }
  0x47   :  { %308 = vsyncpa [#allocation3 + $0x1], 1 }

</bundles_post_ra>
